<compile_context>
chip_gen: v5e
topology: v5e:2x2
jax: 0.10.0
libtpu: 0.0.40
codegen_flags: <defaults>
</compile_context>

<pallas_src>
import math
import functools

import jax
import jax.numpy as jnp
from jax import lax
from jax.experimental import pallas as pl
from jax.experimental.pallas import tpu as pltpu


def find_multiple(n: int, k: int) -> int:
    if n % k == 0:
        return n
    return n + k - n % k


# ---------------------------------------------------------------------------
# Pallas kernel: one transformer block, one batch element per grid step.
# ---------------------------------------------------------------------------
def _block_kernel(x_ref, cos_ref, sina_ref, sinb_ref, g1_ref, g2_ref,
                  wqkv_ref, wc_ref, w12_ref, w3_ref, o_ref,
                  *, seq_len: int, n_head: int, head_dim: int,
                  n_hidden: int, eps: float):
    T, H, d = seq_len, n_head, head_dim
    C = H * d
    half = d // 2

    x = x_ref[...].astype(jnp.float32)            # (T, C) f32, one batch element
    cos = cos_ref[...]                            # (T, C) f32
    sina = sina_ref[...]                          # -sin on first-half-of-head lanes, 0 else
    sinb = sinb_ref[...]                          # +sin on second-half-of-head lanes, 0 else

    def mm(a_bf16, w_bf16):                       # bf16 operands, f32 accumulation (MXU)
        return jnp.dot(a_bf16, w_bf16, preferred_element_type=jnp.float32)

    # ---------------- RMSNorm 1 (f32 stats) ----------------
    ms1 = jnp.mean(x * x, axis=-1, keepdims=True)
    xn1 = (x * lax.rsqrt(ms1 + eps) * g1_ref[...]).astype(jnp.bfloat16)

    # ---------------- fused q|k|v projection (single GEMM) ----------------
    qkv = mm(xn1, wqkv_ref[...])                  # (T, 3C) f32; Wq pre-scaled by 1/sqrt(d)
    q = qkv[:, :C]
    k = qkv[:, C:2 * C]
    v = qkv[:, 2 * C:].astype(jnp.bfloat16)

    # ---------------- RoPE via XLU lane rolls (no extra GEMMs / weights) --------
    # rotate_half per head:  out[j] = -t[j+half] if j_in_head < half else t[j-half]
    # Cross-head wraparound lanes are zeroed by the signed sin tables.
    def rope(t):
        t_up = pltpu.roll(t, C - half, 1)         # [j] = t[j + half]  (mod C)
        t_dn = pltpu.roll(t, half, 1)             # [j] = t[j - half]  (mod C)
        return (t * cos + t_up * sina + t_dn * sinb).astype(jnp.bfloat16)

    q = rope(q)                                   # (T, C) bf16
    k = rope(k)

    # ---------------- causal attention; c_proj fused into the head loop ---------
    row = lax.broadcasted_iota(jnp.int32, (T, T), 0)
    col = lax.broadcasted_iota(jnp.int32, (T, T), 1)
    bias = jnp.where(col <= row, 0.0, -1e30).astype(jnp.float32)   # (T, T), built once

    attn = jnp.zeros((T, C), jnp.float32)
    # TODO(synk): fold the per-head loop into one head-batched einsum once a cheap
    # (T, C)->(H, T, d) relayout is available; at production sizes also tile the
    # MLP hidden dim as an "arbitrary" reduction axis with an f32 VMEM accumulator.
    for h in range(H):
        sl = slice(h * d, (h + 1) * d)
        qh, kh, vh = q[:, sl], k[:, sl], v[:, sl]
        s = jnp.einsum('qd,kd->qk', qh, kh,
                       preferred_element_type=jnp.float32) + bias   # (T, T) f32
        m = jnp.max(s, axis=-1, keepdims=True)
        p = jnp.exp(s - m)
        l = jnp.sum(p, axis=-1, keepdims=True)
        yh = mm(p.astype(jnp.bfloat16), vh)                          # (T, d) f32
        yh = yh * pl.reciprocal(l, approx=True)    # normalize on (T, d), not (T, T)
        attn += mm(yh.astype(jnp.bfloat16), wc_ref[sl, :])           # fused c_proj

    x2 = x + attn                                  # residual 1 (f32)

    # ---------------- RMSNorm 2 + SwiGLU MLP (fused fc1|fc2 GEMM) ----------------
    ms2 = jnp.mean(x2 * x2, axis=-1, keepdims=True)
    xn2 = (x2 * lax.rsqrt(ms2 + eps) * g2_ref[...]).astype(jnp.bfloat16)

    h12 = mm(xn2, w12_ref[...])                    # (T, 2*n_hidden) f32
    h1 = h12[:, :n_hidden]
    h2 = h12[:, n_hidden:]
    hidden = (jax.nn.silu(h1) * h2).astype(jnp.bfloat16)
    mlp = mm(hidden, w3_ref[...])

    o_ref[...] = (x2 + mlp).astype(o_ref.dtype)


# ---------------------------------------------------------------------------
# One-time host-side weight prep (cache per model, NOT per forward call).
# ---------------------------------------------------------------------------
def prepare_block_params(params, *, n_head: int, head_dim: int):
    C = n_head * head_dim
    half = head_dim // 2
    bf = lambda a: a.astype(jnp.bfloat16)

    wq_scaled = params["wq_t"] * (1.0 / math.sqrt(head_dim))   # fold attention scale
    wqkv = jnp.concatenate([wq_scaled, params["wkv_t"]], axis=1)          # (C, 3C)
    w12 = jnp.concatenate([params["w1_t"], params["w2_t"]], axis=1)       # (C, 2*n_hidden)

    # RoPE tables laid out on the flat head-major C lanes, shape (T, C).
    cos = jnp.tile(params["cos"], (1, n_head)).astype(jnp.float32)
    sin = jnp.tile(params["sin"], (1, n_head)).astype(jnp.float32)
    lane_in_head = (jnp.arange(C) % head_dim)[None, :]
    first = lane_in_head < half
    sina = jnp.where(first, -sin, 0.0).astype(jnp.float32)
    sinb = jnp.where(first, 0.0, sin).astype(jnp.float32)

    return dict(
        cos=cos, sina=sina, sinb=sinb,
        rms1=params["rms1"].astype(jnp.float32),
        rms2=params["rms2"].astype(jnp.float32),
        wqkv=bf(wqkv), wc=bf(params["wc_t"]), w12=bf(w12), w3=bf(params["w3_t"]),
        n_hidden=int(params["w1_t"].shape[1]),
    )


# ---------------------------------------------------------------------------
# Wrapper: grid over batch elements, weights resident via constant index_maps.
# ---------------------------------------------------------------------------
def block_forward(x, prepped, *, n_head: int, head_dim: int, eps: float = 1e-5):
    B, T, C = x.shape
    n_hidden = prepped["n_hidden"]

    kernel = functools.partial(_block_kernel, seq_len=T, n_head=n_head,
                               head_dim=head_dim, n_hidden=n_hidden, eps=eps)

    rows = pl.BlockSpec((T, C), lambda b: (b, 0))                 # activation row tile
    full = lambda shape: pl.BlockSpec(shape, lambda b: (0, 0))    # VMEM-resident consts

    flops = (2 * B * T * C * 3 * C            # qkv
             + 2 * B * T * C * C              # c_proj
             + 4 * B * n_head * T * T * head_dim   # attention
             + 2 * B * T * C * 2 * n_hidden   # fc1|fc2
             + 2 * B * T * n_hidden * C)      # mlp proj
    transcendentals = B * n_head * T * T + B * T * n_hidden + 4 * B * T
    bytes_accessed = (2 * B * T * C * 4                                   # x in/out f32
                      + (3 * T * C + 2 * C) * 4                           # tables + gains
                      + (3 * C * C + C * C + 2 * C * n_hidden + n_hidden * C) * 2)  # bf16 weights

    # TODO(synk): at production sizes (C=4096, n_hidden=11008) additionally tile the
    # MLP hidden dim ("arbitrary" axis + f32 accumulator) and raise vmem_limit_bytes;
    # the resident-weight design here assumes the block's weights fit in VMEM.
    out2d = pl.pallas_call(
        kernel,
        grid=(B,),
        in_specs=[
            rows,                                               # x rows (T, C)
            full((T, C)), full((T, C)), full((T, C)),           # cos, sina, sinb
            full((1, C)), full((1, C)),                         # rms gains
            full((C, 3 * C)), full((C, C)),                     # wqkv, wc
            full((C, 2 * n_hidden)), full((n_hidden, C)),       # w12, w3
        ],
        out_specs=rows,
        out_shape=jax.ShapeDtypeStruct((B * T, C), x.dtype),
        compiler_params=pltpu.CompilerParams(
            dimension_semantics=("parallel",)),
        cost_estimate=pl.CostEstimate(flops=flops,
                                      transcendentals=transcendentals,
                                      bytes_accessed=bytes_accessed),
    )(x.reshape(B * T, C), prepped["cos"], prepped["sina"], prepped["sinb"],
      prepped["rms1"], prepped["rms2"], prepped["wqkv"], prepped["wc"],
      prepped["w12"], prepped["w3"])

    return out2d.reshape(B, T, C)


# ---------------------------------------------------------------------------
# Pure-JAX f32 reference (mirrors the PyTorch forward, use_kv_cache=False)
# ---------------------------------------------------------------------------
def block_reference(x, params, *, n_head: int, head_dim: int, eps: float = 1e-5):
    B, T, C = x.shape
    d = head_dim

    def rmsnorm(v, scale):
        ms = jnp.mean(v.astype(jnp.float32) ** 2, axis=-1, keepdims=True)
        return (v * lax.rsqrt(ms + eps)) * scale

    def rotate_half(t):
        t1 = t[..., : d // 2]
        t2 = t[..., d // 2:]
        return jnp.concatenate([-t2, t1], axis=-1)

    xn = rmsnorm(x, params["rms1"][0])
    q = xn @ params["wq_t"]
    kv = xn @ params["wkv_t"]
    k, v = kv[..., :C], kv[..., C:]
    q = q.reshape(B, T, n_head, d).transpose(0, 2, 1, 3)
    k = k.reshape(B, T, n_head, d).transpose(0, 2, 1, 3)
    v = v.reshape(B, T, n_head, d).transpose(0, 2, 1, 3)
    cos = params["cos"][None, None]
    sin = params["sin"][None, None]
    q = q * cos + rotate_half(q) * sin
    k = k * cos + rotate_half(k) * sin
    s = jnp.einsum("bhtd,bhsd->bhts", q, k) / math.sqrt(d)
    mask = jnp.tril(jnp.ones((T, T), bool))
    s = jnp.where(mask, s, -jnp.inf)
    p = jax.nn.softmax(s, axis=-1)
    y = jnp.einsum("bhts,bhsd->bhtd", p, v)
    y = y.transpose(0, 2, 1, 3).reshape(B, T, C)
    x2 = x + y @ params["wc_t"]

    xn2 = rmsnorm(x2, params["rms2"][0])
    h = jax.nn.silu(xn2 @ params["w1_t"]) * (xn2 @ params["w2_t"])
    return x2 + h @ params["w3_t"]


# ---------------------------------------------------------------------------
# Main
# ---------------------------------------------------------------------------
if __name__ == "__main__":
    # Small config consistent with LTSMConfig structure
    n_head = 4
    n_embd_per_head = 32
    C = n_head * n_embd_per_head                 # 128
    hidden_dim = 4 * C
    n_hidden = find_multiple(int(2 * hidden_dim / 3), 256)   # 512
    B, T = 2, 8
    d = n_embd_per_head

    key = jax.random.PRNGKey(0)
    keys = jax.random.split(key, 8)
    scale = 0.02

    # RoPE cos/sin cache (LlamaRotaryEmbedding, base=10000)
    inv_freq = 1.0 / (10000.0 ** (jnp.arange(0, d, 2, dtype=jnp.float32) / d))
    t = jnp.arange(T, dtype=jnp.float32)
    freqs = jnp.einsum("i,j->ij", t, inv_freq)               # (T, d/2)
    emb = jnp.concatenate([freqs, freqs], axis=-1)           # (T, d)

    params = {
        "cos": jnp.cos(emb).astype(jnp.float32),
        "sin": jnp.sin(emb).astype(jnp.float32),
        "rms1": jnp.ones((1, C), jnp.float32),
        "rms2": jnp.ones((1, C), jnp.float32),
        # pre-transposed (in_features, out_features) so kernel does h @ W
        "wq_t": scale * jax.random.normal(keys[0], (C, C), jnp.float32),
        "wkv_t": scale * jax.random.normal(keys[1], (C, 2 * C), jnp.float32),
        "wc_t": scale * jax.random.normal(keys[2], (C, C), jnp.float32),
        "w1_t": scale * jax.random.normal(keys[3], (C, n_hidden), jnp.float32),
        "w2_t": scale * jax.random.normal(keys[4], (C, n_hidden), jnp.float32),
        "w3_t": scale * jax.random.normal(keys[5], (n_hidden, C), jnp.float32),
    }

    x = jax.random.normal(keys[6], (B, T, C), jnp.float32)

    prepped = prepare_block_params(params, n_head=n_head, head_dim=d)  # once per model
    out = block_forward(x, prepped, n_head=n_head, head_dim=d)
    out = jax.block_until_ready(out)

    ref = block_reference(x, params, n_head=n_head, head_dim=d)
    assert out.shape == (B, T, C)
    # bf16 matmul operands (f32 accumulation) vs. pure-f32 reference -> bf16-level tolerance.
    assert jnp.allclose(out, ref, rtol=5e-3, atol=5e-3), float(jnp.max(jnp.abs(out - ref)))

    # TODO(synk): the use_kv_cache=True incremental-decoding path (stateful kv_cache
    # concatenation) is not implemented; only the training/prefill path is kernelized.
    print("KERNEL_OK")
</pallas_src>

<mosaic_0001>
module attributes {stable_mosaic.version = 11 : i64} {
  func.func @_block_kernel(%arg0: i32, %arg1: memref<8x128xf32, #tpu.memory_space<vmem>>, %arg2: memref<8x128xf32, #tpu.memory_space<vmem>>, %arg3: memref<8x128xf32, #tpu.memory_space<vmem>>, %arg4: memref<8x128xf32, #tpu.memory_space<vmem>>, %arg5: memref<1x128xf32, #tpu.memory_space<vmem>>, %arg6: memref<1x128xf32, #tpu.memory_space<vmem>>, %arg7: memref<128x384xbf16, #tpu.memory_space<vmem>>, %arg8: memref<128x128xbf16, #tpu.memory_space<vmem>>, %arg9: memref<128x1024xbf16, #tpu.memory_space<vmem>>, %arg10: memref<512x128xbf16, #tpu.memory_space<vmem>>, %arg11: memref<8x128xf32, #tpu.memory_space<vmem>>) attributes {dimension_semantics = [#tpu.dimension_semantics<parallel>], iteration_bounds = array<i64: 2>, scalar_prefetch = 0 : i64, scratch_operands = 0 : i64, tpu.core_type = #tpu.core_type<tc>, window_params = [{transform_indices = @transform_0, window_bounds = array<i64: 8, 128>}, {pipeline_mode = #tpu.pipeline_mode<synchronous>, transform_indices = @transform_1, window_bounds = array<i64: 8, 128>}, {pipeline_mode = #tpu.pipeline_mode<synchronous>, transform_indices = @transform_2, window_bounds = array<i64: 8, 128>}, {pipeline_mode = #tpu.pipeline_mode<synchronous>, transform_indices = @transform_3, window_bounds = array<i64: 8, 128>}, {pipeline_mode = #tpu.pipeline_mode<synchronous>, transform_indices = @transform_4, window_bounds = array<i64: 1, 128>}, {pipeline_mode = #tpu.pipeline_mode<synchronous>, transform_indices = @transform_5, window_bounds = array<i64: 1, 128>}, {pipeline_mode = #tpu.pipeline_mode<synchronous>, transform_indices = @transform_6, window_bounds = array<i64: 128, 384>}, {pipeline_mode = #tpu.pipeline_mode<synchronous>, transform_indices = @transform_7, window_bounds = array<i64: 128, 128>}, {pipeline_mode = #tpu.pipeline_mode<synchronous>, transform_indices = @transform_8, window_bounds = array<i64: 128, 1024>}, {pipeline_mode = #tpu.pipeline_mode<synchronous>, transform_indices = @transform_9, window_bounds = array<i64: 512, 128>}, {transform_indices = @transform_10, window_bounds = array<i64: 8, 128>}]} {
    %c0 = arith.constant 0 : index
    %c0_0 = arith.constant 0 : index
    %0 = vector.load %arg1[%c0, %c0_0] : memref<8x128xf32, #tpu.memory_space<vmem>>, vector<8x128xf32>
    %c0_1 = arith.constant 0 : index
    %c0_2 = arith.constant 0 : index
    %1 = vector.load %arg2[%c0_1, %c0_2] : memref<8x128xf32, #tpu.memory_space<vmem>>, vector<8x128xf32>
    %c0_3 = arith.constant 0 : index
    %c0_4 = arith.constant 0 : index
    %2 = vector.load %arg3[%c0_3, %c0_4] : memref<8x128xf32, #tpu.memory_space<vmem>>, vector<8x128xf32>
    %c0_5 = arith.constant 0 : index
    %c0_6 = arith.constant 0 : index
    %3 = vector.load %arg4[%c0_5, %c0_6] : memref<8x128xf32, #tpu.memory_space<vmem>>, vector<8x128xf32>
    %4 = arith.mulf %0, %0 : vector<8x128xf32>
    %cst = arith.constant dense<0.000000e+00> : vector<8xf32>
    %5 = vector.multi_reduction <add>, %4, %cst [1] : vector<8x128xf32> to vector<8xf32>
    %6 = vector.shape_cast %5 : vector<8xf32> to vector<8x1xf32>
    %cst_7 = arith.constant 1.280000e+02 : f32
    %7 = vector.broadcast %cst_7 : f32 to vector<8x1xf32>
    %8 = arith.divf %6, %7 : vector<8x1xf32>
    %cst_8 = arith.constant 9.99999974E-6 : f32
    %9 = vector.broadcast %cst_8 : f32 to vector<8x1xf32>
    %10 = arith.addf %8, %9 : vector<8x1xf32>
    %11 = math.rsqrt %10 : vector<8x1xf32>
    %12 = vector.broadcast %11 : vector<8x1xf32> to vector<8x128xf32>
    %13 = arith.mulf %0, %12 : vector<8x128xf32>
    %c0_9 = arith.constant 0 : index
    %c0_10 = arith.constant 0 : index
    %14 = vector.load %arg5[%c0_9, %c0_10] : memref<1x128xf32, #tpu.memory_space<vmem>>, vector<1x128xf32>
    %15 = vector.broadcast %14 : vector<1x128xf32> to vector<8x128xf32>
    %16 = arith.mulf %13, %15 : vector<8x128xf32>
    %17 = arith.truncf %16 : vector<8x128xf32> to vector<8x128xbf16>
    %c0_11 = arith.constant 0 : index
    %c0_12 = arith.constant 0 : index
    %18 = vector.load %arg7[%c0_11, %c0_12] : memref<128x384xbf16, #tpu.memory_space<vmem>>, vector<128x384xbf16>
    %cst_13 = arith.constant dense<0.000000e+00> : vector<8x384xf32>
    %19 = tpu.matmul %17, %18, %cst_13 {dimension_numbers = #tpu.dot_dimension_numbers<[1], [0], [0], [1], [0, 0, 1, 1], [], []>} : vector<8x128xbf16>, vector<128x384xbf16>, vector<8x384xf32> -> vector<8x384xf32>
    %20 = vector.extract_strided_slice %19 {offsets = [0, 0], sizes = [8, 128], strides = [1, 1]} : vector<8x384xf32> to vector<8x128xf32>
    %21 = vector.extract_strided_slice %19 {offsets = [0, 128], sizes = [8, 128], strides = [1, 1]} : vector<8x384xf32> to vector<8x128xf32>
    %22 = vector.extract_strided_slice %19 {offsets = [0, 256], sizes = [8, 128], strides = [1, 1]} : vector<8x384xf32> to vector<8x128xf32>
    %23 = arith.truncf %22 : vector<8x128xf32> to vector<8x128xbf16>
    %c112_i32 = arith.constant 112 : i32
    %24 = tpu.dynamic_rotate %20 by %c112_i32 dim 1 : vector<8x128xf32>, i32 -> vector<8x128xf32>
    %c16_i32 = arith.constant 16 : i32
    %25 = tpu.dynamic_rotate %20 by %c16_i32 dim 1 : vector<8x128xf32>, i32 -> vector<8x128xf32>
    %26 = arith.mulf %20, %1 : vector<8x128xf32>
    %27 = arith.mulf %24, %2 : vector<8x128xf32>
    %28 = arith.addf %26, %27 : vector<8x128xf32>
    %29 = arith.mulf %25, %3 : vector<8x128xf32>
    %30 = arith.addf %28, %29 : vector<8x128xf32>
    %31 = arith.truncf %30 : vector<8x128xf32> to vector<8x128xbf16>
    %c112_i32_14 = arith.constant 112 : i32
    %32 = tpu.dynamic_rotate %21 by %c112_i32_14 dim 1 : vector<8x128xf32>, i32 -> vector<8x128xf32>
    %c16_i32_15 = arith.constant 16 : i32
    %33 = tpu.dynamic_rotate %21 by %c16_i32_15 dim 1 : vector<8x128xf32>, i32 -> vector<8x128xf32>
    %34 = arith.mulf %21, %1 : vector<8x128xf32>
    %35 = arith.mulf %32, %2 : vector<8x128xf32>
    %36 = arith.addf %34, %35 : vector<8x128xf32>
    %37 = arith.mulf %33, %3 : vector<8x128xf32>
    %38 = arith.addf %36, %37 : vector<8x128xf32>
    %39 = arith.truncf %38 : vector<8x128xf32> to vector<8x128xbf16>
    %40 = tpu.iota {dimensions = array<i32: 0>} : vector<8x8xi32>
    %41 = tpu.iota {dimensions = array<i32: 1>} : vector<8x8xi32>
    %42 = arith.cmpi sle, %41, %40 : vector<8x8xi32>
    %cst_16 = arith.constant 0.000000e+00 : f32
    %cst_17 = arith.constant -1.000000e+30 : f32
    %43 = vector.broadcast %cst_16 : f32 to vector<8x8xf32>
    %44 = vector.broadcast %cst_17 : f32 to vector<8x8xf32>
    %45 = arith.select %42, %43, %44 : vector<8x8xi1>, vector<8x8xf32>
    %cst_18 = arith.constant 0.000000e+00 : f32
    %46 = vector.broadcast %cst_18 : f32 to vector<8x128xf32>
    %47 = vector.extract_strided_slice %31 {offsets = [0, 0], sizes = [8, 32], strides = [1, 1]} : vector<8x128xbf16> to vector<8x32xbf16>
    %48 = vector.extract_strided_slice %39 {offsets = [0, 0], sizes = [8, 32], strides = [1, 1]} : vector<8x128xbf16> to vector<8x32xbf16>
    %49 = vector.extract_strided_slice %23 {offsets = [0, 0], sizes = [8, 32], strides = [1, 1]} : vector<8x128xbf16> to vector<8x32xbf16>
    "tpu.trace_start"() <{level = 10 : i32, message = "qd,kd->qk"}> : () -> ()
    %cst_19 = arith.constant dense<0.000000e+00> : vector<8x8xf32>
    %50 = tpu.matmul %47, %48, %cst_19 {dimension_numbers = #tpu.dot_dimension_numbers<[1], [1], [0], [0], [0, 0, 1, 0], [], []>} : vector<8x32xbf16>, vector<8x32xbf16>, vector<8x8xf32> -> vector<8x8xf32>
    "tpu.trace_stop"() : () -> ()
    %51 = arith.addf %50, %45 : vector<8x8xf32>
    %cst_20 = arith.constant dense<0xFF800000> : vector<8xf32>
    %52 = vector.multi_reduction <maximumf>, %51, %cst_20 [1] : vector<8x8xf32> to vector<8xf32>
    %53 = vector.shape_cast %52 : vector<8xf32> to vector<8x1xf32>
    %54 = vector.broadcast %53 : vector<8x1xf32> to vector<8x8xf32>
    %55 = arith.subf %51, %54 : vector<8x8xf32>
    %56 = math.exp %55 : vector<8x8xf32>
    %cst_21 = arith.constant dense<0.000000e+00> : vector<8xf32>
    %57 = vector.multi_reduction <add>, %56, %cst_21 [1] : vector<8x8xf32> to vector<8xf32>
    %58 = vector.shape_cast %57 : vector<8xf32> to vector<8x1xf32>
    %59 = arith.truncf %56 : vector<8x8xf32> to vector<8x8xbf16>
    %cst_22 = arith.constant dense<0.000000e+00> : vector<8x32xf32>
    %60 = tpu.matmul %59, %49, %cst_22 {dimension_numbers = #tpu.dot_dimension_numbers<[1], [0], [0], [1], [0, 0, 1, 1], [], []>} : vector<8x8xbf16>, vector<8x32xbf16>, vector<8x32xf32> -> vector<8x32xf32>
    %61 = tpu.reciprocal %58 {approx = true} : vector<8x1xf32> -> vector<8x1xf32>
    %62 = vector.broadcast %61 : vector<8x1xf32> to vector<8x32xf32>
    %63 = arith.mulf %60, %62 : vector<8x32xf32>
    %64 = arith.truncf %63 : vector<8x32xf32> to vector<8x32xbf16>
    %c0_23 = arith.constant 0 : index
    %c0_24 = arith.constant 0 : index
    %65 = vector.load %arg8[%c0_23, %c0_24] : memref<128x128xbf16, #tpu.memory_space<vmem>>, vector<32x128xbf16>
    %cst_25 = arith.constant dense<0.000000e+00> : vector<8x128xf32>
    %66 = tpu.matmul %64, %65, %cst_25 {dimension_numbers = #tpu.dot_dimension_numbers<[1], [0], [0], [1], [0, 0, 1, 1], [], []>} : vector<8x32xbf16>, vector<32x128xbf16>, vector<8x128xf32> -> vector<8x128xf32>
    %67 = arith.addf %46, %66 : vector<8x128xf32>
    %68 = vector.extract_strided_slice %31 {offsets = [0, 32], sizes = [8, 32], strides = [1, 1]} : vector<8x128xbf16> to vector<8x32xbf16>
    %69 = vector.extract_strided_slice %39 {offsets = [0, 32], sizes = [8, 32], strides = [1, 1]} : vector<8x128xbf16> to vector<8x32xbf16>
    %70 = vector.extract_strided_slice %23 {offsets = [0, 32], sizes = [8, 32], strides = [1, 1]} : vector<8x128xbf16> to vector<8x32xbf16>
    "tpu.trace_start"() <{level = 10 : i32, message = "qd,kd->qk"}> : () -> ()
    %cst_26 = arith.constant dense<0.000000e+00> : vector<8x8xf32>
    %71 = tpu.matmul %68, %69, %cst_26 {dimension_numbers = #tpu.dot_dimension_numbers<[1], [1], [0], [0], [0, 0, 1, 0], [], []>} : vector<8x32xbf16>, vector<8x32xbf16>, vector<8x8xf32> -> vector<8x8xf32>
    "tpu.trace_stop"() : () -> ()
    %72 = arith.addf %71, %45 : vector<8x8xf32>
    %cst_27 = arith.constant dense<0xFF800000> : vector<8xf32>
    %73 = vector.multi_reduction <maximumf>, %72, %cst_27 [1] : vector<8x8xf32> to vector<8xf32>
    %74 = vector.shape_cast %73 : vector<8xf32> to vector<8x1xf32>
    %75 = vector.broadcast %74 : vector<8x1xf32> to vector<8x8xf32>
    %76 = arith.subf %72, %75 : vector<8x8xf32>
    %77 = math.exp %76 : vector<8x8xf32>
    %cst_28 = arith.constant dense<0.000000e+00> : vector<8xf32>
    %78 = vector.multi_reduction <add>, %77, %cst_28 [1] : vector<8x8xf32> to vector<8xf32>
    %79 = vector.shape_cast %78 : vector<8xf32> to vector<8x1xf32>
    %80 = arith.truncf %77 : vector<8x8xf32> to vector<8x8xbf16>
    %cst_29 = arith.constant dense<0.000000e+00> : vector<8x32xf32>
    %81 = tpu.matmul %80, %70, %cst_29 {dimension_numbers = #tpu.dot_dimension_numbers<[1], [0], [0], [1], [0, 0, 1, 1], [], []>} : vector<8x8xbf16>, vector<8x32xbf16>, vector<8x32xf32> -> vector<8x32xf32>
    %82 = tpu.reciprocal %79 {approx = true} : vector<8x1xf32> -> vector<8x1xf32>
    %83 = vector.broadcast %82 : vector<8x1xf32> to vector<8x32xf32>
    %84 = arith.mulf %81, %83 : vector<8x32xf32>
    %85 = arith.truncf %84 : vector<8x32xf32> to vector<8x32xbf16>
    %c32 = arith.constant 32 : index
    %c0_30 = arith.constant 0 : index
    %86 = vector.load %arg8[%c32, %c0_30] : memref<128x128xbf16, #tpu.memory_space<vmem>>, vector<32x128xbf16>
    %cst_31 = arith.constant dense<0.000000e+00> : vector<8x128xf32>
    %87 = tpu.matmul %85, %86, %cst_31 {dimension_numbers = #tpu.dot_dimension_numbers<[1], [0], [0], [1], [0, 0, 1, 1], [], []>} : vector<8x32xbf16>, vector<32x128xbf16>, vector<8x128xf32> -> vector<8x128xf32>
    %88 = arith.addf %67, %87 : vector<8x128xf32>
    %89 = vector.extract_strided_slice %31 {offsets = [0, 64], sizes = [8, 32], strides = [1, 1]} : vector<8x128xbf16> to vector<8x32xbf16>
    %90 = vector.extract_strided_slice %39 {offsets = [0, 64], sizes = [8, 32], strides = [1, 1]} : vector<8x128xbf16> to vector<8x32xbf16>
    %91 = vector.extract_strided_slice %23 {offsets = [0, 64], sizes = [8, 32], strides = [1, 1]} : vector<8x128xbf16> to vector<8x32xbf16>
    "tpu.trace_start"() <{level = 10 : i32, message = "qd,kd->qk"}> : () -> ()
    %cst_32 = arith.constant dense<0.000000e+00> : vector<8x8xf32>
    %92 = tpu.matmul %89, %90, %cst_32 {dimension_numbers = #tpu.dot_dimension_numbers<[1], [1], [0], [0], [0, 0, 1, 0], [], []>} : vector<8x32xbf16>, vector<8x32xbf16>, vector<8x8xf32> -> vector<8x8xf32>
    "tpu.trace_stop"() : () -> ()
    %93 = arith.addf %92, %45 : vector<8x8xf32>
    %cst_33 = arith.constant dense<0xFF800000> : vector<8xf32>
    %94 = vector.multi_reduction <maximumf>, %93, %cst_33 [1] : vector<8x8xf32> to vector<8xf32>
    %95 = vector.shape_cast %94 : vector<8xf32> to vector<8x1xf32>
    %96 = vector.broadcast %95 : vector<8x1xf32> to vector<8x8xf32>
    %97 = arith.subf %93, %96 : vector<8x8xf32>
    %98 = math.exp %97 : vector<8x8xf32>
    %cst_34 = arith.constant dense<0.000000e+00> : vector<8xf32>
    %99 = vector.multi_reduction <add>, %98, %cst_34 [1] : vector<8x8xf32> to vector<8xf32>
    %100 = vector.shape_cast %99 : vector<8xf32> to vector<8x1xf32>
    %101 = arith.truncf %98 : vector<8x8xf32> to vector<8x8xbf16>
    %cst_35 = arith.constant dense<0.000000e+00> : vector<8x32xf32>
    %102 = tpu.matmul %101, %91, %cst_35 {dimension_numbers = #tpu.dot_dimension_numbers<[1], [0], [0], [1], [0, 0, 1, 1], [], []>} : vector<8x8xbf16>, vector<8x32xbf16>, vector<8x32xf32> -> vector<8x32xf32>
    %103 = tpu.reciprocal %100 {approx = true} : vector<8x1xf32> -> vector<8x1xf32>
    %104 = vector.broadcast %103 : vector<8x1xf32> to vector<8x32xf32>
    %105 = arith.mulf %102, %104 : vector<8x32xf32>
    %106 = arith.truncf %105 : vector<8x32xf32> to vector<8x32xbf16>
    %c64 = arith.constant 64 : index
    %c0_36 = arith.constant 0 : index
    %107 = vector.load %arg8[%c64, %c0_36] : memref<128x128xbf16, #tpu.memory_space<vmem>>, vector<32x128xbf16>
    %cst_37 = arith.constant dense<0.000000e+00> : vector<8x128xf32>
    %108 = tpu.matmul %106, %107, %cst_37 {dimension_numbers = #tpu.dot_dimension_numbers<[1], [0], [0], [1], [0, 0, 1, 1], [], []>} : vector<8x32xbf16>, vector<32x128xbf16>, vector<8x128xf32> -> vector<8x128xf32>
    %109 = arith.addf %88, %108 : vector<8x128xf32>
    %110 = vector.extract_strided_slice %31 {offsets = [0, 96], sizes = [8, 32], strides = [1, 1]} : vector<8x128xbf16> to vector<8x32xbf16>
    %111 = vector.extract_strided_slice %39 {offsets = [0, 96], sizes = [8, 32], strides = [1, 1]} : vector<8x128xbf16> to vector<8x32xbf16>
    %112 = vector.extract_strided_slice %23 {offsets = [0, 96], sizes = [8, 32], strides = [1, 1]} : vector<8x128xbf16> to vector<8x32xbf16>
    "tpu.trace_start"() <{level = 10 : i32, message = "qd,kd->qk"}> : () -> ()
    %cst_38 = arith.constant dense<0.000000e+00> : vector<8x8xf32>
    %113 = tpu.matmul %110, %111, %cst_38 {dimension_numbers = #tpu.dot_dimension_numbers<[1], [1], [0], [0], [0, 0, 1, 0], [], []>} : vector<8x32xbf16>, vector<8x32xbf16>, vector<8x8xf32> -> vector<8x8xf32>
    "tpu.trace_stop"() : () -> ()
    %114 = arith.addf %113, %45 : vector<8x8xf32>
    %cst_39 = arith.constant dense<0xFF800000> : vector<8xf32>
    %115 = vector.multi_reduction <maximumf>, %114, %cst_39 [1] : vector<8x8xf32> to vector<8xf32>
    %116 = vector.shape_cast %115 : vector<8xf32> to vector<8x1xf32>
    %117 = vector.broadcast %116 : vector<8x1xf32> to vector<8x8xf32>
    %118 = arith.subf %114, %117 : vector<8x8xf32>
    %119 = math.exp %118 : vector<8x8xf32>
    %cst_40 = arith.constant dense<0.000000e+00> : vector<8xf32>
    %120 = vector.multi_reduction <add>, %119, %cst_40 [1] : vector<8x8xf32> to vector<8xf32>
    %121 = vector.shape_cast %120 : vector<8xf32> to vector<8x1xf32>
    %122 = arith.truncf %119 : vector<8x8xf32> to vector<8x8xbf16>
    %cst_41 = arith.constant dense<0.000000e+00> : vector<8x32xf32>
    %123 = tpu.matmul %122, %112, %cst_41 {dimension_numbers = #tpu.dot_dimension_numbers<[1], [0], [0], [1], [0, 0, 1, 1], [], []>} : vector<8x8xbf16>, vector<8x32xbf16>, vector<8x32xf32> -> vector<8x32xf32>
    %124 = tpu.reciprocal %121 {approx = true} : vector<8x1xf32> -> vector<8x1xf32>
    %125 = vector.broadcast %124 : vector<8x1xf32> to vector<8x32xf32>
    %126 = arith.mulf %123, %125 : vector<8x32xf32>
    %127 = arith.truncf %126 : vector<8x32xf32> to vector<8x32xbf16>
    %c96 = arith.constant 96 : index
    %c0_42 = arith.constant 0 : index
    %128 = vector.load %arg8[%c96, %c0_42] : memref<128x128xbf16, #tpu.memory_space<vmem>>, vector<32x128xbf16>
    %cst_43 = arith.constant dense<0.000000e+00> : vector<8x128xf32>
    %129 = tpu.matmul %127, %128, %cst_43 {dimension_numbers = #tpu.dot_dimension_numbers<[1], [0], [0], [1], [0, 0, 1, 1], [], []>} : vector<8x32xbf16>, vector<32x128xbf16>, vector<8x128xf32> -> vector<8x128xf32>
    %130 = arith.addf %109, %129 : vector<8x128xf32>
    %131 = arith.addf %0, %130 : vector<8x128xf32>
    %132 = arith.mulf %131, %131 : vector<8x128xf32>
    %cst_44 = arith.constant dense<0.000000e+00> : vector<8xf32>
    %133 = vector.multi_reduction <add>, %132, %cst_44 [1] : vector<8x128xf32> to vector<8xf32>
    %134 = vector.shape_cast %133 : vector<8xf32> to vector<8x1xf32>
    %cst_45 = arith.constant 1.280000e+02 : f32
    %135 = vector.broadcast %cst_45 : f32 to vector<8x1xf32>
    %136 = arith.divf %134, %135 : vector<8x1xf32>
    %cst_46 = arith.constant 9.99999974E-6 : f32
    %137 = vector.broadcast %cst_46 : f32 to vector<8x1xf32>
    %138 = arith.addf %136, %137 : vector<8x1xf32>
    %139 = math.rsqrt %138 : vector<8x1xf32>
    %140 = vector.broadcast %139 : vector<8x1xf32> to vector<8x128xf32>
    %141 = arith.mulf %131, %140 : vector<8x128xf32>
    %c0_47 = arith.constant 0 : index
    %c0_48 = arith.constant 0 : index
    %142 = vector.load %arg6[%c0_47, %c0_48] : memref<1x128xf32, #tpu.memory_space<vmem>>, vector<1x128xf32>
    %143 = vector.broadcast %142 : vector<1x128xf32> to vector<8x128xf32>
    %144 = arith.mulf %141, %143 : vector<8x128xf32>
    %145 = arith.truncf %144 : vector<8x128xf32> to vector<8x128xbf16>
    %c0_49 = arith.constant 0 : index
    %c0_50 = arith.constant 0 : index
    %146 = vector.load %arg9[%c0_49, %c0_50] : memref<128x1024xbf16, #tpu.memory_space<vmem>>, vector<128x1024xbf16>
    %cst_51 = arith.constant dense<0.000000e+00> : vector<8x1024xf32>
    %147 = tpu.matmul %145, %146, %cst_51 {dimension_numbers = #tpu.dot_dimension_numbers<[1], [0], [0], [1], [0, 0, 1, 1], [], []>} : vector<8x128xbf16>, vector<128x1024xbf16>, vector<8x1024xf32> -> vector<8x1024xf32>
    %148 = vector.extract_strided_slice %147 {offsets = [0, 0], sizes = [8, 512], strides = [1, 1]} : vector<8x1024xf32> to vector<8x512xf32>
    %149 = vector.extract_strided_slice %147 {offsets = [0, 512], sizes = [8, 512], strides = [1, 1]} : vector<8x1024xf32> to vector<8x512xf32>
    %150 = arith.negf %148 : vector<8x512xf32>
    %151 = math.exp %150 : vector<8x512xf32>
    %cst_52 = arith.constant 1.000000e+00 : f32
    %152 = vector.broadcast %cst_52 : f32 to vector<8x512xf32>
    %153 = arith.addf %152, %151 : vector<8x512xf32>
    %154 = arith.divf %152, %153 : vector<8x512xf32>
    %155 = arith.mulf %148, %154 : vector<8x512xf32>
    %156 = arith.mulf %155, %149 : vector<8x512xf32>
    %157 = arith.truncf %156 : vector<8x512xf32> to vector<8x512xbf16>
    %c0_53 = arith.constant 0 : index
    %c0_54 = arith.constant 0 : index
    %158 = vector.load %arg10[%c0_53, %c0_54] : memref<512x128xbf16, #tpu.memory_space<vmem>>, vector<512x128xbf16>
    %cst_55 = arith.constant dense<0.000000e+00> : vector<8x128xf32>
    %159 = tpu.matmul %157, %158, %cst_55 {dimension_numbers = #tpu.dot_dimension_numbers<[1], [0], [0], [1], [0, 0, 1, 1], [], []>} : vector<8x512xbf16>, vector<512x128xbf16>, vector<8x128xf32> -> vector<8x128xf32>
    %160 = arith.addf %131, %159 : vector<8x128xf32>
    %c0_56 = arith.constant 0 : index
    %c0_57 = arith.constant 0 : index
    %161 = vector.load %arg11[%c0_56, %c0_57] : memref<8x128xf32, #tpu.memory_space<vmem>>, vector<8x128xf32>
    tpu.vector_store %arg11[%c0_56, %c0_57], %160 {strides = array<i32>} : memref<8x128xf32, #tpu.memory_space<vmem>>, vector<8x128xf32>,
    return
  }
  func.func @transform_0(%arg0: i32) -> (i32, i32) {
    %c0_i32 = arith.constant 0 : i32
    %c0_i32_0 = arith.constant 0 : i32
    return %arg0, %c0_i32 : i32, i32
  }
  func.func @transform_1(%arg0: i32) -> (i32, i32) {
    %c0_i32 = arith.constant 0 : i32
    %c0_i32_0 = arith.constant 0 : i32
    %c0_i32_1 = arith.constant 0 : i32
    return %c0_i32, %c0_i32_0 : i32, i32
  }
  func.func @transform_2(%arg0: i32) -> (i32, i32) {
    %c0_i32 = arith.constant 0 : i32
    %c0_i32_0 = arith.constant 0 : i32
    %c0_i32_1 = arith.constant 0 : i32
    return %c0_i32, %c0_i32_0 : i32, i32
  }
  func.func @transform_3(%arg0: i32) -> (i32, i32) {
    %c0_i32 = arith.constant 0 : i32
    %c0_i32_0 = arith.constant 0 : i32
    %c0_i32_1 = arith.constant 0 : i32
    return %c0_i32, %c0_i32_0 : i32, i32
  }
  func.func @transform_4(%arg0: i32) -> (i32, i32) {
    %c0_i32 = arith.constant 0 : i32
    %c0_i32_0 = arith.constant 0 : i32
    %c0_i32_1 = arith.constant 0 : i32
    return %c0_i32, %c0_i32_0 : i32, i32
  }
  func.func @transform_5(%arg0: i32) -> (i32, i32) {
    %c0_i32 = arith.constant 0 : i32
    %c0_i32_0 = arith.constant 0 : i32
    %c0_i32_1 = arith.constant 0 : i32
    return %c0_i32, %c0_i32_0 : i32, i32
  }
  func.func @transform_6(%arg0: i32) -> (i32, i32) {
    %c0_i32 = arith.constant 0 : i32
    %c0_i32_0 = arith.constant 0 : i32
    %c0_i32_1 = arith.constant 0 : i32
    return %c0_i32, %c0_i32_0 : i32, i32
  }
  func.func @transform_7(%arg0: i32) -> (i32, i32) {
    %c0_i32 = arith.constant 0 : i32
    %c0_i32_0 = arith.constant 0 : i32
    %c0_i32_1 = arith.constant 0 : i32
    return %c0_i32, %c0_i32_0 : i32, i32
  }
  func.func @transform_8(%arg0: i32) -> (i32, i32) {
    %c0_i32 = arith.constant 0 : i32
    %c0_i32_0 = arith.constant 0 : i32
    %c0_i32_1 = arith.constant 0 : i32
    return %c0_i32, %c0_i32_0 : i32, i32
  }
  func.func @transform_9(%arg0: i32) -> (i32, i32) {
    %c0_i32 = arith.constant 0 : i32
    %c0_i32_0 = arith.constant 0 : i32
    %c0_i32_1 = arith.constant 0 : i32
    return %c0_i32, %c0_i32_0 : i32, i32
  }
  func.func @transform_10(%arg0: i32) -> (i32, i32) {
    %c0_i32 = arith.constant 0 : i32
    %c0_i32_0 = arith.constant 0 : i32
    return %arg0, %c0_i32 : i32, i32
  }
}

</mosaic_0001>

<bundles_post_ra>
// kernel: tpu_custom_call.1
= control target key start
LH: loop header
LB: loop body
LE: loop exit
PB: predicated region body
PF: predicated region fallthrough
CT: control target
= control target key end

     0   :  { %s3720_s0 = inlined_call_operand.hbm [shape: f32[16,128], index: 0, kind: input, shape index: {}]   ;;  %s3721_s1 = inlined_call_operand.hbm [shape: f32[8,128], index: 1, kind: input, shape index: {}]   ;;  %s3722_s2 = inlined_call_operand.hbm [shape: f32[8,128], index: 2, kind: input, shape index: {}]   ;;  %s3723_s3 = inlined_call_operand.hbm [shape: f32[8,128], index: 3, kind: input, shape index: {}]   ;;  %s3724_s4 = inlined_call_operand.vmem [shape: f32[1,128], index: 4, kind: input, shape index: {}]   ;;  %s3725_s5 = inlined_call_operand.vmem [shape: f32[1,128], index: 5, kind: input, shape index: {}]   ;;  %s3726_s6 = inlined_call_operand.hbm [shape: bf16[128,384], index: 6, kind: input, shape index: {}]   ;;  %s3727_s7 = inlined_call_operand.hbm [shape: bf16[128,128], index: 7, kind: input, shape index: {}]   ;;  %s3728_s8 = inlined_call_operand.hbm [shape: bf16[128,1024], index: 8, kind: input, shape index: {}]   ;;  %s3729_s9 = inlined_call_operand.hbm [shape: bf16[512,128], index: 9, kind: input, shape index: {}]   ;;  %s3730_s10 = inlined_call_operand.hbm [shape: f32[16,128], index: 10, kind: output, shape index: {}]  }
   0x1   :  { %3731 = sst [smem:[#allocation23_spill]] %s3721_s1 }
   0x2   :  { %3732 = sst [smem:[#allocation24_spill]] %s3722_s2 }
   0x3   :  { %3733 = sst [smem:[#allocation25_spill]] %s3723_s3 }
   0x4   :  { %3734 = sst [smem:[#allocation26_spill]] %s3726_s6 }
   0x5   :  { %15 = vsyncpa [#allocation3], 0 }
   0x6   :  { %17 = vsyncpa [#allocation3 + $0x1], 0 }
   0x7   :  { %18 = vsyncpa [#allocation6], 0 }
   0x8   :  { %19 = vsyncpa [#allocation9], 0 }
   0x9   :  { %20 = vsyncpa [#allocation12], 0 }
   0xa   :  { %21 = vsyncpa [#allocation15], 0 }
   0xb   :  { %22 = vsyncpa [#allocation4], 0 }
   0xc   :  { %24 = vsyncpa [#allocation4 + $0x1], 0  ;;  %s3424_s13 = smov 0   ;;  %s3426_s14 = smov 0  }
   0xd   :  { %s3428_s15 = smov 0   ;;  %s3430_s16 = smov 0  }
   0xe LB: > { %s3735_s1 = sld [smem:[#allocation23_spill]]  ;;  %s3448_s20 = sadd.s32 4294967295, %s3347_s16   ;;  %s3347_s16 = sphi %s3430_s16, %s3749_s16   ;;  %s3343_s15 = sphi %s3428_s15, %s3748_s15   ;;  %s3339_s14 = sphi %s3426_s14, %s3747_s14   ;;  %s3335_s13 = sphi %s3424_s13, %s3746_s13  }
   0xf   : > { %p2174_p0 = scmp.ge.s32.totalorder %s3347_s16, 1  ;;  %p51_p1 = scmp.eq.s32.totalorder %s3448_s20, 0 }
  0x10   : > { %p276_p2 = scmp.lt.s32.totalorder %s3347_s16, 3  ;;  %s3349_s22 = smov [#allocation5]  }
  0x11   : > { %s290_s23 = sshll.u32 %s3349_s22, 4  ;;  %s3737_s3 = sld [smem:[#allocation25_spill]]  ;;  %s291_s23 = int_to_ptr.vmem [resolvable:$true] %s290_s23 }
  0x12   : > { %p3453_p3 = pnand %p2174_p0, %p276_p2  ;;  %s3350_s28 = smov [#allocation8]  }
  0x13   : > { %s314_s29 = sshll.u32 %s3350_s28, 4  ;;  %s343_s12 = sshll.u32 %s3727_s7, 4  ;;  %s315_s29 = int_to_ptr.vmem [resolvable:$true] %s314_s29  ;;  %s344_s12 = int_to_ptr.hbm [resolvable:$true] %s343_s12 }
  0x14   : > { %s288_s19 = sshll.u32 %s3735_s1, 4  ;;  %p2887_p5 = pneg %p3453_p3  ;;  %s289_s19 = int_to_ptr.hbm [resolvable:$true] %s288_s19 }
  0x15   : > { %s3351_s17 = smov [#allocation11]   ;;  %s3739_s2 = sld [smem:[#allocation24_spill]] }
  0x16   : > { %p3465_p6 = pnand %p2887_p5, %p51_p1  ;;  %s345_s18 = sshll.u32 %s3351_s17, 4  ;;  %s346_s18 = int_to_ptr.vmem [resolvable:$true] %s345_s18 }
  0x17   : > { %s312_s26 = sshll.u32 %s3737_s3, 4  ;;  %s3352_s1 = smov 64   ;;  %s313_s26 = int_to_ptr.hbm [resolvable:$true] %s312_s26 }
  0x18   : > { %2890 = dma.hbm_to_vmem [thread:$0]  (!%p3465_p6), %s289_s19, 128, %s291_s23, [#allocation6]  }
  0x19   : > { %2896 = dma.hbm_to_vmem [thread:$0]  (!%p3465_p6), %s313_s26, 128, %s315_s29, [#allocation9]  }
  0x1a   : > { %s3353_s28 = smov 4   ;;  %s3354_s30 = smov [#allocation7]  }
  0x1b   : > { %s300_s25 = sshll.u32 %s3739_s2, 4  ;;  %s302_s19 = sshll.u32 %s3354_s30, 4  ;;  %s301_s25 = int_to_ptr.hbm [resolvable:$true] %s300_s25  ;;  %s303_s19 = int_to_ptr.vmem [resolvable:$true] %s302_s19 }
  0x1c   : > { %2902 = dma.hbm_to_vmem [thread:$0]  (!%p3465_p6), %s344_s12, 1024, %s346_s18, [#allocation12], %s3352_s1, %s3352_s1, %s3353_s28  }
  0x1d   : > { %s3740_s6 = sld [smem:[#allocation26_spill]]  ;;  %s3355_s11 = smov [#allocation10]  }
  0x1e   : > { %2893 = dma.hbm_to_vmem [thread:$0]  (!%p3465_p6), %s301_s25, 128, %s303_s19, [#allocation6]  }
  0x1f   : > { %s331_s17 = sshll.u32 %s3355_s11, 4  ;;  %s357_s2 = sshll.u32 %s3728_s8, 4  ;;  %s332_s17 = int_to_ptr.vmem [resolvable:$true] %s331_s17  ;;  %s358_s2 = int_to_ptr.hbm [resolvable:$true] %s357_s2 }
  0x20   : > { %s3356_s12 = smov 192   ;;  %s3357_s18 = smov 12  }
  0x21   : > { %s3358_s30 = smov [#allocation13]   ;;  %s3359_s19 = smov 512  }
  0x22   : > { %s359_s25 = sshll.u32 %s3358_s30, 4  ;;  %s3360_s23 = smov 32   ;;  %s360_s25 = int_to_ptr.vmem [resolvable:$true] %s359_s25 }
  0x23   : > { %s329_s29 = sshll.u32 %s3740_s6, 4  ;;  %s2173_s24 = sadd.s32 4294967294, %s3347_s16   ;;  %s330_s29 = int_to_ptr.hbm [resolvable:$true] %s329_s29 }
  0x24   : > { %2899 = dma.hbm_to_vmem [thread:$0]  (!%p3465_p6), %s330_s29, 3072, %s332_s17, [#allocation9], %s3356_s12, %s3356_s12, %s3357_s18  }
  0x25   : > { %2905 = dma.hbm_to_vmem [thread:$0]  (!%p3465_p6), %s358_s2, 8192, %s360_s25, [#allocation12], %s3359_s19, %s3359_s19, %s3360_s23  }
  0x26   : > { %s371_s29 = sshll.u32 %s3729_s9, 4  ;;  %s3361_s17 = smov [#allocation14]   ;;  %s372_s29 = int_to_ptr.hbm [resolvable:$true] %s371_s29 }
  0x27   : > { %s373_s22 = sshll.u32 %s3361_s17, 4  ;;  %s3506_s12 = sadd.s32 1, %s3347_s16   ;;  %s374_s22 = int_to_ptr.vmem [resolvable:$true] %s373_s22 }
  0x28   : > { %2908 = dma.hbm_to_vmem [thread:$0]  (!%p3465_p6), %s372_s29, 4096, %s374_s22, [#allocation15], %s3352_s1, %s3352_s1, %s3353_s28  }
  0x29   : > { %s37_s2 = sadd.s32 1, %s3343_s15  ;;  %s34_s18 = ssub.s32 %s3347_s16, %s3506_s12 }
  0x2a   : > { %p44_p7 = scmp.ne.s32.totalorder %s3343_s15, %s3339_s14  ;;  %p35_p8 = scmp.eq.s32.totalorder %s34_s18, 0 }
  0x2b   : > { %p45_p9 = scmp.eq.s32.totalorder %s3347_s16, 0  ;;  %p50_p10 = scmp.ne.s32.totalorder %s3339_s14, %s3335_s13 }
  0x2c   : > { %p263_p11 = scmp.eq.s32.totalorder %s3448_s20, 1  ;;  %p269_p0 = scmp.eq.s32.totalorder %s2173_s24, 1 }
  0x2d   : > { %s3518_s30 = scalar_select %p35_p8, %s3343_s15, %s37_s2  }
  0x2e   : > { %p3522_p12 = por %p51_p1, %p50_p10  ;;  %p3526_p13 = por %p263_p11, %p44_p7 }
  0x2f   : > { %p46_p2 = por %p45_p9, %p44_p7  ;;  %s387_s28 = sand.u32 1, %s3343_s15  }
  0x30   : > { %p3531_p5 = por %p269_p0, %p50_p10  ;;  %p2924_p6 = scmp.lt.s32.totalorder %s3347_s16, 2 }
  0x31   : > { %s2183_s19 = sshll.u32 %s387_s28, 3  ;;  %s2184_s23 = sshll.u32 %s3347_s16, 3 }
  0x32   : > { %s395_s29 = scalar_lea.hbm %s3720_s0, %s2184_s23  ;;  %s391_s22 = scalar_lea.vmem [#allocation2], %s2183_s19 }
  0x33   : > { %s397_s17 = sshll.u32 %s395_s29, 4  ;;  %s399_s2 = sshll.u32 %s391_s22, 4  ;;  %s398_s17 = int_to_ptr.hbm [resolvable:$true] %s397_s17  ;;  %s400_s2 = int_to_ptr.vmem [resolvable:$true] %s399_s2 }
  0x34   : > { %p3540_p8 = pnand %p2924_p6, %p46_p2  ;;  %s388_s18 = scalar_lea.sflag [#allocation3], %s387_s28 }
  0x35   : > { %s3235_s3 = sshra.s32 %s398_s17, 4  ;;  %s3242_s19 = scalar_lea.hbm %s3720_s0, 16  ;;  %s3236_s3 = int_to_ptr.hbm [resolvable:$true] %s3235_s3 }
  0x36   : > { %s3237_s6 = scalar_lea.hbm %s3236_s3, 8  ;;  %p3239_p9 = pneg %p3540_p8 }
  0x37   : > { %p3238_p7 = scmp.ne.s32.totalorder %s3236_s3, %s3237_s6  ;;  %p3243_p0 = scmp.lt.s32.totalorder %s3236_s3, %s3720_s0 }
  0x38   : > { %p3244_p2 = scmp.lt.s32.totalorder %s3242_s19, %s3237_s6 }
  0x39   : > { %p3240_p10 = pnand %p3239_p9, %p3238_p7 }
  0x3a   : > { %p3245_p6 = por %p3244_p2, %p3243_p0 }
  0x3b   : > { %p3241_p11 = pneg %p3240_p10 }
  0x3d   : > { %p3246_p4 = pnand %p3245_p6, %p3241_p11 }
  0x3f   : > { %3249 = shalt.err (!%p3246_p4)
}
  0x40   : > { %2912 = dma.hbm_to_vmem [thread:$0]  (!%p3540_p8), %s398_s17, 128, %s400_s2, %s388_s18  }
  0x41   : > { %408 = sbr.rel (%p3453_p3) target bundleno = 1884 (0x75c), region = 60  ;;  %s3557_s28 = sand.u32 (!%p3453_p3), 1, %s3339_s14  }
  0x42   : > { %s2186_s22 = sshll.u32 (!%p3453_p3), %s3557_s28, 3  ;;  %s411_s23 = scalar_lea.sflag (!%p3453_p3), [#allocation3], %s3557_s28 }
  0x43   : > { %s414_s3 = scalar_lea.vmem (!%p3453_p3), [#allocation2], %s2186_s22 }
  0x46   : > { %3310 = dma.done.wait (%p3522_p12), %s411_s23, 128  }
  0x47   : > { %3312 = vsyncadd (%p3522_p12), %s411_s23, 4294967168 }
  0x48   : > { %3314 = dma.done.wait (%p51_p1), [#allocation6], 256  }
  0x49   : > { %3316 = vsyncadd (%p51_p1), [#allocation6], 4294967040 }
  0x4a   : > { %3318 = dma.done.wait (%p51_p1), [#allocation9], 3200  }
  0x4b   : > { %3320 = vsyncadd (%p51_p1), [#allocation9], 4294964096 }
  0x4c   : > { %3322 = dma.done.wait (%p51_p1), [#allocation12], 9216  }
  0x4d   : > { %3324 = vsyncadd (%p51_p1), [#allocation12], 4294958080 }
  0x4e   : > { %3326 = dma.done.wait (%p51_p1), [#allocation15], 4096  }
  0x4f   : > { %3328 = vsyncadd (%p51_p1), [#allocation15], 4294963200  ;;  %v3583_v0 = vld [vmem:[%s414_s3] sm:$0xff]  ;;  %v2281_v1 = vld [vmem:[#allocation10 + $0xa8] sm:$0xf]  ;;  %v3362_v27 = vmov 128.0  }
  0x50   : > { %v2749_v2 = vld [vmem:[#allocation10 + $0xb0] sm:$0xf0]  ;;  %v492_v3 = vmul.f32 %v3583_v0, %v3583_v0  ;;  %v2748_v5 = vld [vmem:[#allocation10 + $0xac] sm:$0xf]  ;;  %v2283_v6 = vld [vmem:[#allocation10 + $0xb4] sm:$0xf0]  ;;  %2987 = vrcp.f32 %v3362_v27 }
  0x51   : > { %v2282_v4 = vor.u32 %v2749_v2, %v2281_v1  ;;  %v2289_v7 = vld [vmem:[#allocation10 + $0xb0] sm:$0xf]  ;;  %v2286_v8 = vor.u32 %v2748_v5, %v2283_v6  ;;  %v2750_v9 = vld [vmem:[#allocation10 + $0xb8] sm:$0xf0]  ;;  %v2745_v13 = vld [vmem:[#allocation10 + $0x94] sm:$0xf] }
  0x52   : > { %493 = vadd.xlane.f32.xlu0 %v492_v3  ;;  %v2290_v10 = vor.u32 %v2750_v9, %v2289_v7  ;;  %v2269_v11 = vld [vmem:[#allocation10 + $0x90] sm:$0xf]  ;;  %v2746_v12 = vld [vmem:[#allocation10 + $0x98] sm:$0xf0]  ;;  %v2271_v15 = vld [vmem:[#allocation10 + $0x9c] sm:$0xf0] }
  0x53   : > { %681 = vmatpush.bf16.msra.mxu0 %v2282_v4  ;;  %694 = vmatpush.bf16.msra.mxu1 %v2286_v8  ;;  %v2270_v14 = vor.u32 %v2746_v12, %v2269_v11  ;;  %v2277_v16 = vld [vmem:[#allocation10 + $0x98] sm:$0xf]  ;;  %v2747_v17 = vld [vmem:[#allocation10 + $0xa0] sm:$0xf0]  ;;  %v2274_v18 = vor.u32 %v2745_v13, %v2271_v15  ;;  %v2742_v22 = vld [vmem:[#allocation10 + $0x7c] sm:$0xf] }
  0x54   : > { %707 = vmatpush.bf16.msra.mxu2 %v2290_v10  ;;  %v2278_v19 = vor.u32 %v2747_v17, %v2277_v16  ;;  %v2257_v20 = vld [vmem:[#allocation10 + $0x78] sm:$0xf]  ;;  %v2743_v21 = vld [vmem:[#allocation10 + $0x80] sm:$0xf0]  ;;  %v2259_v24 = vld [vmem:[#allocation10 + $0x84] sm:$0xf0] }
  0x55   : > { %v2258_v23 = vor.u32 %v2743_v21, %v2257_v20  ;;  %v2265_v25 = vld [vmem:[#allocation10 + $0x80] sm:$0xf]  ;;  %v2744_v26 = vld [vmem:[#allocation10 + $0x88] sm:$0xf0]  ;;  %v2262_v28 = vor.u32 %v2742_v22, %v2259_v24  ;;  %v2739_v32 = vld [vmem:[#allocation10 + $0x64] sm:$0xf] }
  0x56   : > { %v2266_v29 = vor.u32 %v2744_v26, %v2265_v25  ;;  %v2245_v30 = vld [vmem:[#allocation10 + $0x60] sm:$0xf]  ;;  %v2740_v31 = vld [vmem:[#allocation10 + $0x68] sm:$0xf0]  ;;  %v2247_v34 = vld [vmem:[#allocation10 + $0x6c] sm:$0xf0]  ;;  %v2988_v39 = vpop.eup %2987 }
  0x57   : > { %682 = vmatpush.bf16.msra.mxu0 %v2270_v14  ;;  %695 = vmatpush.bf16.msra.mxu1 %v2274_v18  ;;  %v2246_v33 = vor.u32 %v2740_v31, %v2245_v30  ;;  %v2253_v35 = vld [vmem:[#allocation10 + $0x68] sm:$0xf]  ;;  %v2741_v36 = vld [vmem:[#allocation10 + $0x70] sm:$0xf0]  ;;  %v2250_v37 = vor.u32 %v2739_v32, %v2247_v34  ;;  %v2736_v42 = vld [vmem:[#allocation10 + $0x4c] sm:$0xf]  ;;  %vm500_vm0 = vweird.f32 %v2988_v39 }
  0x58   : > { %708 = vmatpush.bf16.msra.mxu2 %v2278_v19  ;;  %v2254_v38 = vor.u32 %v2741_v36, %v2253_v35  ;;  %v2233_v40 = vld [vmem:[#allocation10 + $0x48] sm:$0xf]  ;;  %v2737_v41 = vld [vmem:[#allocation10 + $0x50] sm:$0xf0]  ;;  %v2235_v44 = vld [vmem:[#allocation10 + $0x54] sm:$0xf0] }
  0x59   : > { %v2234_v43 = vor.u32 %v2737_v41, %v2233_v40  ;;  %v2241_v45 = vld [vmem:[#allocation10 + $0x50] sm:$0xf]  ;;  %v2738_v46 = vld [vmem:[#allocation10 + $0x58] sm:$0xf0]  ;;  %v2238_v47 = vor.u32 %v2736_v42, %v2235_v44  ;;  %v496_v49 = vmul.f32 128.0, %v2988_v39  ;;  %s3363_s27 = smov 16  }
  0x5a   : > { %v2242_v48 = vor.u32 %v2738_v46, %v2241_v45  ;;  %v2221_v50 = vld [vmem:[#allocation10 + $0x30] sm:$0xf]  ;;  %v2734_v51 = vld [vmem:[#allocation10 + $0x38] sm:$0xf0]  ;;  %v2733_v52 = vld [vmem:[#allocation10 + $0x34] sm:$0xf] }
  0x5b   : > { %683 = vmatpush.bf16.msra.mxu0 %v2258_v23  ;;  %696 = vmatpush.bf16.msra.mxu1 %v2262_v28  ;;  %v2222_v53 = vor.u32 %v2734_v51, %v2221_v50  ;;  %v2223_v54 = vld [vmem:[#allocation10 + $0x3c] sm:$0xf0]  ;;  %v2229_v55 = vld [vmem:[#allocation10 + $0x38] sm:$0xf]  ;;  %v2735_v56 = vld [vmem:[#allocation10 + $0x40] sm:$0xf0] }
  0x5c   : > { %709 = vmatpush.bf16.msra.mxu2 %v2266_v29  ;;  %v2226_v57 = vor.u32 %v2733_v52, %v2223_v54  ;;  %v2230_v58 = vor.u32 %v2735_v56, %v2229_v55  ;;  %v497_v59 = vsub.f32 1.0, %v496_v49  ;;  %v2209_v60 = vld [vmem:[#allocation10 + $0x18] sm:$0xf]  ;;  %v2731_v61 = vld [vmem:[#allocation10 + $0x20] sm:$0xf0]  ;;  %s3364_s17 = smov 112  }
  0x5d   : > { %v2730_v62 = vld [vmem:[#allocation10 + $0x1c] sm:$0xf]  ;;  %v2210_v63 = vor.u32 %v2731_v61, %v2209_v60  ;;  %v2211_v1 = vld [vmem:[#allocation10 + $0x24] sm:$0xf0]  ;;  %v2217_v2 = vld [vmem:[#allocation10 + $0x20] sm:$0xf] }
  0x5e   : > { %v2732_v3 = vld [vmem:[#allocation10 + $0x28] sm:$0xf0]  ;;  %v2214_v4 = vor.u32 %v2730_v62, %v2211_v1  ;;  %v2197_v6 = vld [vmem:[#allocation10] sm:$0xf]  ;;  %v2727_v8 = vld [vmem:[#allocation10 + $0x4] sm:$0xf]  ;;  %v498_v9 = vmul.f32 %v2988_v39, %v497_v59 }
  0x5f   : > { %684 = vmatpush.bf16.msra.mxu0 %v2246_v33  ;;  %697 = vmatpush.bf16.msra.mxu1 %v2250_v37  ;;  %v2218_v5 = vor.u32 %v2732_v3, %v2217_v2  ;;  %v2728_v7 = vld [vmem:[#allocation10 + $0x8] sm:$0xf0]  ;;  %v2199_v11 = vld [vmem:[#allocation10 + $0xc] sm:$0xf0]  ;;  %v2205_v12 = vld [vmem:[#allocation10 + $0x8] sm:$0xf] }
  0x60   : > { %710 = vmatpush.bf16.msra.mxu2 %v2254_v38  ;;  %v2198_v10 = vor.u32 %v2728_v7, %v2197_v6  ;;  %v2729_v13 = vld [vmem:[#allocation10 + $0x10] sm:$0xf0]  ;;  %v2202_v14 = vor.u32 %v2727_v8, %v2199_v11  ;;  %v499_v16 = vadd.f32 %v2988_v39, %v498_v9  ;;  %v2985_v27 = vld [vmem:[%s3724_s4] ss:$0 sm:$0xff]  ;;  %v489_v38 = vld [vmem:[#allocation5] sm:$0xff]  ;;  %vm747_vm4 = vcmask 261120  }
  0x61   : > { %v2206_v15 = vor.u32 %v2729_v13, %v2205_v12  ;;  %v491_v44 = vld [vmem:[#allocation8] sm:$0xff]  ;;  %vm781_vm5 = vcmask 1043456   ;;  %s3365_s2 = smov 96   ;;  %s3366_s24 = smov 32   ;;  %v2752_v1 = vld [vmem:[#allocation11 + $0x8] sm:$0xff]  ;;  %v2751_v2 = vld [vmem:[#allocation11] sm:$0xff]  ;;  %v741_v6 = vlaneseq }
  0x62   : > { %v3587_v17 = vsel %vm500_vm0, %v2988_v39, %v499_v16  ;;  %v490_v39 = vld [vmem:[#allocation7] sm:$0xff]  ;;  %v3367_v11 = vmov -1e+30   ;;  %vm767_vm7 = vcmask 64512   ;;  %s3368_s18 = smov 64   ;;  %s2724_s11 = sshll.u32 %s3448_s20, 3 }
  0x63   : > { %685 = vmatpush.bf16.msra.mxu0 %v2234_v43  ;;  %698 = vmatpush.bf16.msra.mxu1 %v2238_v47  ;;  %v742_v7 = vshrl.u32 %v741_v6, 7  ;;  %v744_v8 = vand.u32 127, %v741_v6  ;;  %s2031_s3 = scalar_lea.hbm %s3730_s10, %s2724_s11  ;;  %s486_s6 = scalar_lea.vmem [#allocation16], %s2186_s22 }
  0x64   : > { %711 = vmatpush.bf16.msra.mxu2 %v2242_v48  ;;  %s2033_s21 = sshll.u32 %s486_s6, 4  ;;  %s2021_s20 = scalar_lea.sflag [#allocation4], %s3557_s28  ;;  %s2034_s21 = int_to_ptr.vmem [resolvable:$true] %s2033_s21 }
  0x65   : > { %vm745_vm6 = vcmp.le.s32.totalorder %v744_v8, %v742_v7 }
  0x66   : > { %v3603_v12 = vsel %vm745_vm6, 0.0, %v3367_v11 }
  0x67   : > { %686 = vmatpush.bf16.msra.mxu0 %v2222_v53  ;;  %699 = vmatpush.bf16.msra.mxu1 %v2226_v57 }
  0x68   : > { %712 = vmatpush.bf16.msra.mxu2 %v2230_v58 }
  0x6b   : > { %687 = vmatpush.bf16.msra.mxu0 %v2210_v63  ;;  %700 = vmatpush.bf16.msra.mxu1 %v2214_v4 }
  0x6c   : > { %713 = vmatpush.bf16.msra.mxu2 %v2218_v5 }
  0x6f   : > { %688 = vmatpush.bf16.msra.mxu0 %v2198_v10  ;;  %701 = vmatpush.bf16.msra.mxu1 %v2202_v14 }
  0x70   : > { %714 = vmatpush.bf16.msra.mxu2 %v2206_v15 }
  0x74   : > { %924 = vmatpush.bf16.msrb.mxu2 %v2752_v1 }
  0x78   : > { %925 = vmatpush.bf16.msrb.mxu2 %v2751_v2 }
  0xc5   : > { %v494_v18 = vpop.xlane.xlu0 %493 }
  0xc6   : > { %v502_v19 = vmul.f32 %v3587_v17, %v494_v18 }
  0xc8   : > { %v503_v20 = vadd.f32 1e-05, %v502_v19 }
  0xca   : > { %2989 = vrsqrt.f32 %v503_v20  ;;  %vm510_vm2 = vweird.f32 %v503_v20 }
  0xd0   : > { %v2990_v21 = vpop.eup %2989 }
  0xd1   : > { %v505_v22 = vmul.f32 %v2990_v21, %v503_v20  ;;  %vm511_vm1 = vweird.f32 %v2990_v21 }
  0xd2   : > { %vm512_vm3 = vmor %vm510_vm2, %vm511_vm1 }
  0xd3   : > { %v506_v23 = vmul.f32 %v2990_v21, %v505_v22 }
  0xd5   : > { %v507_v24 = vmul.f32 0.5, %v506_v23 }
  0xd7   : > { %v508_v25 = vsub.f32 1.5, %v507_v24 }
  0xd9   : > { %v509_v26 = vmul.f32 %v2990_v21, %v508_v25 }
  0xdb   : > { %v513_v28 = vsel %vm512_vm3, %v2990_v21, %v509_v26 }
  0xdc   : > { %v514_v29 = vmul.f32 %v513_v28, %v3583_v0 }
  0xde   : > { %v519_v30 = vmul.f32 %v2985_v27, %v514_v29 }
  0xe0   : > { %v520_v31 = vpack.c.bf16 %v519_v30, %v519_v30 }
  0xe2   : > { %689 = vmatmul.bf16.vlgmr.msra.gmra.mxu0 %v520_v31  ;;  %702 = vmatmul.bf16.vlgmr.msra.gmra.mxu1 %v520_v31 }
  0xe3   : > { %715 = vmatmul.bf16.vlgmr.msra.gmra.mxu2 %v520_v31 }
 0x15f   : > { %v690_v32 = vpop.f32.mrf.mxu0  ;;  %v703_v33 = vpop.f32.mrf.mxu1 }
 0x160   : > { %733 = vrot.lane.b32.xlu1 %v703_v33, %s3363_s27  ;;  %731 = vrot.lane.b32.xlu0 %v703_v33, %s3364_s17  ;;  %v735_v42 = vmul.f32 %v703_v33, %v489_v38  ;;  %v725_v52 = vmul.f32 %v690_v32, %v489_v38 }
 0x161   : > { %723 = vrot.lane.b32.xlu2 %v690_v32, %s3363_s27  ;;  %s2035_s27 = sshll.u32 %s2031_s3, 4  ;;  %s2036_s27 = int_to_ptr.hbm [resolvable:$true] %s2035_s27 }
 0x166   : > { %v716_v34 = vpop.f32.mrf.mxu2 }
 0x167   : > { %v692_v35 = vpop.f32.mrf.mxu0  ;;  %v705_v36 = vpop.f32.mrf.mxu1  ;;  %v720_v48 = vpack.c.bf16 %v716_v34, %v716_v34 }
 0x168   : > { %721 = vrot.lane.b32.xlu1 %v690_v32, %s3364_s17  ;;  %s3279_s17 = sshra.s32 %s2036_s27, 4  ;;  %s3280_s17 = int_to_ptr.hbm [resolvable:$true] %s3279_s17 }
 0x169   : > { %v783_v56 = vsel %vm781_vm5, %v720_v48, 0  ;;  %v845_v18 = vunpack.c.l.b16 %v720_v48  ;;  %p3286_p12 = scmp.lt.s32.totalorder %s3280_s17, %s3730_s10 }
 0x16b   : > { %v846_v19 = vpack.c.b16 %v845_v18, %v845_v18 }
 0x16e   : > { %v718_v37 = vpop.f32.mrf.mxu2 }
 0x1bb   : > { %v724_v50 = vpop.permute.xlu2 %723 }
 0x1bc   : > { %v728_v57 = vmul.f32 %v724_v50, %v491_v44 }
 0x1d2   : > { %v734_v40 = vpop.permute.xlu1 %733  ;;  %v732_v41 = vpop.permute.xlu0 %731 }
 0x1d3   : > { %v736_v43 = vmul.f32 %v732_v41, %v490_v39  ;;  %v738_v45 = vmul.f32 %v734_v40, %v491_v44 }
 0x1d5   : > { %v737_v46 = vadd.f32 %v736_v43, %v735_v42 }
 0x1d7   : > { %v739_v47 = vadd.f32 %v738_v45, %v737_v46 }
 0x1d9   : > { %v740_v49 = vpack.c.bf16 %v739_v47, %v739_v47 }
 0x1da   : > { %v722_v51 = vpop.permute.xlu1 %721 }
 0x1db   : > { %v726_v53 = vmul.f32 %v722_v51, %v490_v39  ;;  %v752_v54 = vsel %vm747_vm4, %v740_v49, 0  ;;  %v811_v55 = vunpack.c.l.b16 %v740_v49 }
 0x1dc   : > { %761 = vmatpush.bf16.xpose.msra.mxu3 %v752_v54 }
 0x1dd   : > { %v727_v58 = vadd.f32 %v726_v53, %v725_v52  ;;  %v812_v59 = vpack.c.b16 %v811_v55, %v811_v55 }
 0x1df   : > { %813 = vrot.lane.b32.xlu0 %v812_v59, %s3365_s2  ;;  %v729_v60 = vadd.f32 %v728_v57, %v727_v58 }
 0x1e1   : > { %v730_v61 = vpack.c.bf16 %v729_v60, %v729_v60 }
 0x1e3   : > { %2291 = vmatmul.msk.bf16.vlgmr.msra.gmra.mxu3 %vm747_vm4, %v730_v61  ;;  %v806_v62 = vunpack.c.l.b16 %v730_v61 }
 0x1e4   : > { %792 = vmatpush.bf16.msrb.mxu3 %v783_v56 }
 0x1e5   : > { %v807_v63 = vpack.c.b16 %v806_v62, %v806_v62  ;;  %v2754_v62 = vld [vmem:[#allocation11 + $0x18] sm:$0xff] }
 0x1e6   : > { %896 = vmatpush.bf16.msrb.mxu1 %v2754_v62  ;;  %v2539_v62 = vld [vmem:[#allocation13 + $0x1a8] sm:$0xf0] }
 0x1e7   : > { %808 = vrot.lane.b32.xlu0 %v807_v63, %s3365_s2 }
 0x1ef   : > { %1023 = vrot.lane.b32.xlu0 %v812_v59, %s3366_s24 }
 0x1f7   : > { %1021 = vrot.lane.b32.xlu0 %v807_v63, %s3366_s24 }
 0x251   : > { %v814_v3 = vpop.permute.xlu0 %813 }
 0x252   : > { %v819_v4 = vsel %vm747_vm4, %v814_v3, 0 }
 0x253   : > { %828 = vmatpush.bf16.xpose.msra.mxu3 %v819_v4 }
 0x259   : > { %v809_v5 = vpop.permute.xlu0 %808 }
 0x261   : > { %v1024_v9 = vpop.permute.xlu0 %1023 }
 0x262   : > { %v1029_v10 = vsel %vm747_vm4, %v1024_v9, 0 }
 0x263   : > { %1038 = vmatpush.bf16.xpose.msra.mxu2 %v1029_v10 }
 0x266   : > { %v763_v13 = vpop.f32.mrf.mxu3 }
 0x267   : > { %v764_v14 = vadd.f32 %v763_v13, %v3603_v12 }
 0x269   : > { %v768_v15 = vsel %vm767_vm7, %v764_v14, -inf  ;;  %v1022_v40 = vpop.permute.xlu0 %1021 }
 0x26a   : > { %769 = vmax.xlane.f32.xlu2 %v768_v15 }
 0x26e   : > { %v765_v16 = vpop.f32.mrf.mxu3 }
 0x282   : > { %933 = vrot.lane.b32.xlu2 %v812_v59, %s3368_s18 }
 0x28a   : > { %847 = vrot.lane.b32.xlu2 %v846_v19, %s3365_s2  ;;  %s3281_s2 = scalar_lea.hbm %s3280_s17, 8 }
 0x28b   : > { %p3282_p1 = scmp.ne.s32.totalorder %s3280_s17, %s3281_s2 }
 0x28d   : > { %p3283_p3 = pnand %p3282_p1, %p3526_p13 }
 0x28f   : > { %p3284_p4 = pneg %p3283_p3 }
 0x2dd   : > { %v770_v20 = vpop.xlane.xlu2 %769 }
 0x2de   : > { %v771_v21 = vsub.f32 %v764_v14, %v770_v20  ;;  %v2756_v20 = vld [vmem:[#allocation11 + $0x28] sm:$0xff] }
 0x2e0   : > { %v772_v22 = vmul.f32 1.442695, %v771_v21  ;;  %v2755_v21 = vld [vmem:[#allocation11 + $0x20] sm:$0xff] }
 0x2e2   : > { %2991 = vpow2.f32 %v772_v22  ;;  %v2758_v22 = vld [vmem:[#allocation11 + $0x38] sm:$0xff] }
 0x2e5   : > { %v934_v23 = vpop.permute.xlu2 %933 }
 0x2e6   : > { %v939_v27 = vsel %vm747_vm4, %v934_v23, 0  ;;  %v2757_v23 = vld [vmem:[#allocation11 + $0x30] sm:$0xff] }
 0x2e8   : > { %v2992_v24 = vpop.eup %2991 }
 0x2e9   : > { %v774_v25 = vsel %vm767_vm7, %v2992_v24, 0.0  ;;  %v777_v26 = vpack.c.bf16 %v2992_v24, %v2992_v24 }
 0x2ea   : > { %775 = vadd.xlane.f32.xlu1 %v774_v25 }
 0x2eb   : > { %2292 = vmatmul.msk.bf16.vlgmr.msrb.gmra.mxu3 %vm767_vm7, %v777_v26 }
 0x2ec   : > { %948 = vmatpush.bf16.xpose.msrb.mxu3 %v939_v27 }
 0x2ed   : > { %v848_v28 = vpop.permute.xlu2 %847 }
 0x2ee   : > { %v853_v29 = vsel %vm781_vm5, %v848_v28, 0 }
 0x2ef   : > { %862 = vmatpush.bf16.msrb.mxu0 %v853_v29 }
 0x2fb   : > { %2293 = vmatmul.msk.bf16.vlgmr.msra.gmra.mxu3 %vm747_vm4, %v809_v5 }
 0x303   : > { %931 = vrot.lane.b32.xlu1 %v807_v63, %s3368_s18  ;;  %v2753_v63 = vld [vmem:[#allocation11 + $0x10] sm:$0xff] }
 0x304   : > { %897 = vmatpush.bf16.msrb.mxu1 %v2753_v63  ;;  %v2497_v63 = vld [vmem:[#allocation13 + $0x140] sm:$0xf] }
 0x308   : > { %1013 = vmatpush.bf16.msra.mxu1 %v2756_v20  ;;  %v2792_v20 = vld [vmem:[#allocation13 + $0x10c] sm:$0xf] }
 0x30c   : > { %1014 = vmatpush.bf16.msra.mxu1 %v2755_v21  ;;  %v2475_v21 = vld [vmem:[#allocation13 + $0x128] sm:$0xf0] }
 0x35d   : > { %v776_v30 = vpop.xlane.xlu1 %775 }
 0x35e   : > { %2993 = vrcp.f32 %v776_v30 }
 0x364   : > { %v2994_v31 = vpop.eup %2993 }
 0x36e   : > { %v794_v32 = vpop.f32.mrf.mxu3 }
 0x36f   : > { %v799_v33 = vmul.f32 %v2994_v31, %v794_v32 }
 0x371   : > { %v800_v34 = vpack.c.bf16 %v799_v33, %v799_v33 }
 0x373   : > { %2312 = vmatmul.msk.bf16.vlgmr.msrb.gmra.mxu2 %vm747_vm4, %v800_v34 }
 0x375   : > { %v932_v35 = vpop.permute.xlu1 %931 }
 0x376   : > { %v796_v36 = vpop.f32.mrf.mxu3  ;;  %2313 = vmatmul.msk.bf16.vlgmr.msrb.gmra.mxu3 %vm747_vm4, %v932_v35 }
 0x37e   : > { %v830_v37 = vpop.f32.mrf.mxu3 }
 0x37f   : > { %v831_v38 = vadd.f32 %v830_v37, %v3603_v12 }
 0x381   : > { %v834_v39 = vsel %vm767_vm7, %v831_v38, -inf }
 0x382   : > { %835 = vmax.xlane.f32.xlu0 %v834_v39  ;;  %v2819_v39 = vld [vmem:[#allocation13 + $0x1dc] sm:$0xf0] }
 0x383   : > { %2324 = vmatmul.msk.bf16.vlgmr.msra.gmra.mxu2 %vm747_vm4, %v1022_v40  ;;  %v2815_v40 = vld [vmem:[#allocation13 + $0x1c4] sm:$0xf] }
 0x386   : > { %v832_v41 = vpop.f32.mrf.mxu3 }
 0x396   : > { %1054 = vrot.lane.b32.xlu0 %v846_v19, %s3366_s24 }
 0x39e   : > { %964 = vrot.lane.b32.xlu0 %v846_v19, %s3368_s18  ;;  %s3285_s18 = scalar_lea.hbm %s3730_s10, 16 }
 0x39f   : > { %p3287_p8 = scmp.lt.s32.totalorder %s3285_s18, %s3281_s2 }
 0x3a1   : > { %p3288_p7 = por %p3287_p8, %p3286_p12 }
 0x3a3   : > { %p3289_p9 = pnand %p3288_p7, %p3284_p4 }
 0x3f5   : > { %v836_v42 = vpop.xlane.xlu0 %835 }
 0x3f6   : > { %v837_v43 = vsub.f32 %v831_v38, %v836_v42  ;;  %v3622_v44 = vpop.f32.mrf.mxu2  ;;  %v2561_v38 = vld [vmem:[#allocation13 + $0x1c0] sm:$0xf]  ;;  %v2563_v42 = vld [vmem:[#allocation13 + $0x1e0] sm:$0xf0] }
 0x3f7   : > { %v2562_v41 = vor.u32 %v2819_v39, %v2561_v38  ;;  %v2435_v39 = vld [vmem:[#allocation13 + $0xe0] sm:$0xf0] }
 0x3f8   : > { %v838_v45 = vmul.f32 1.442695, %v837_v43  ;;  %v2569_v43 = vld [vmem:[#allocation13 + $0x1c8] sm:$0xf] }
 0x3f9   : > { %v950_v46 = vpop.f32.mrf.mxu3 }
 0x3fa   : > { %2995 = vpow2.f32 %v838_v45  ;;  %v951_v47 = vadd.f32 %v950_v46, %v3603_v12  ;;  %v2820_v45 = vld [vmem:[#allocation13 + $0x1e4] sm:$0xf0]  ;;  %v2566_v46 = vor.u32 %v2815_v40, %v2563_v42 }
 0x3fb   : > { %v2441_v40 = vld [vmem:[#allocation13 + $0xc8] sm:$0xf] }
 0x3fc   : > { %v954_v48 = vsel %vm767_vm7, %v951_v47, -inf  ;;  %1531 = vmatpush.bf16.msrb.mxu2 %v2566_v46  ;;  %v2779_v46 = vld [vmem:[#allocation13 + $0x9c] sm:$0xf0] }
 0x3fd   : > { %955 = vmax.xlane.f32.xlu1 %v954_v48  ;;  %v2816_v48 = vld [vmem:[#allocation13 + $0x1cc] sm:$0xf] }
 0x3fe   : > { %v929_v49 = vpop.f32.mrf.mxu2 }
 0x3ff   : > { %v2571_v49 = vld [vmem:[#allocation13 + $0x1e8] sm:$0xf0] }
 0x400   : > { %v2996_v50 = vpop.eup %2995 }
 0x401   : > { %v952_v51 = vpop.f32.mrf.mxu3  ;;  %v843_v52 = vpack.c.bf16 %v2996_v50, %v2996_v50  ;;  %v840_v61 = vsel %vm767_vm7, %v2996_v50, 0.0  ;;  %v2529_v50 = vld [vmem:[#allocation13 + $0x180] sm:$0xf] }
 0x402   : > { %v2574_v51 = vor.u32 %v2816_v48, %v2571_v49  ;;  %v2403_v49 = vld [vmem:[#allocation13 + $0xa0] sm:$0xf0] }
 0x403   : > { %2294 = vmatmul.msk.bf16.vlgmr.msrb.gmra.mxu0 %vm767_vm7, %v843_v52  ;;  %v2811_v52 = vld [vmem:[#allocation13 + $0x19c] sm:$0xf0] }
 0x406   : > { %v1040_v53 = vpop.f32.mrf.mxu2 }
 0x407   : > { %v1041_v54 = vadd.f32 %v1040_v53, %v3603_v12  ;;  %v2807_v53 = vld [vmem:[#allocation13 + $0x184] sm:$0xf] }
 0x408   : > { %v1055_v55 = vpop.permute.xlu0 %1054 }
 0x409   : > { %v1060_v56 = vsel %vm781_vm5, %v1055_v55, 0  ;;  %v1044_v57 = vsel %vm767_vm7, %v1041_v54, -inf  ;;  %v2530_v55 = vor.u32 %v2811_v52, %v2529_v50  ;;  %v2409_v50 = vld [vmem:[#allocation13 + $0x88] sm:$0xf] }
 0x40a   : > { %1045 = vmax.xlane.f32.xlu2 %v1044_v57  ;;  %1069 = vmatpush.bf16.msra.mxu3 %v1060_v56  ;;  %v2537_v57 = vld [vmem:[#allocation13 + $0x188] sm:$0xf] }
 0x40e   : > { %v1042_v58 = vpop.f32.mrf.mxu2 }
 0x40f   : > { %v2812_v58 = vld [vmem:[#allocation13 + $0x1a4] sm:$0xf0] }
 0x410   : > { %v965_v59 = vpop.permute.xlu0 %964 }
 0x411   : > { %v970_v60 = vsel %vm781_vm5, %v965_v59, 0  ;;  %v2808_v59 = vld [vmem:[#allocation13 + $0x18c] sm:$0xf] }
 0x412   : > { %841 = vadd.xlane.f32.xlu2 %v840_v61  ;;  %979 = vmatpush.bf16.msra.mxu0 %v970_v60  ;;  %v2538_v61 = vor.u32 %v2812_v58, %v2537_v57  ;;  %v2369_v57 = vld [vmem:[#allocation13 + $0x40] sm:$0xf] }
 0x413   : > { %v2771_v58 = vld [vmem:[#allocation13 + $0x5c] sm:$0xf0] }
 0x416   : > { %1103 = vmatpush.bf16.msrb.mxu0 %v2758_v22 }
 0x41a   : > { %1104 = vmatpush.bf16.msrb.mxu0 %v2757_v23 }
 0x470   : > { %v956_v1 = vpop.xlane.xlu1 %955 }
 0x471   : > { %v957_v2 = vsub.f32 %v951_v47, %v956_v1  ;;  %v2570_v47 = vor.u32 %v2820_v45, %v2569_v43  ;;  %v2803_v1 = vld [vmem:[#allocation13 + $0x15c] sm:$0xf0]  ;;  %v2443_v43 = vld [vmem:[#allocation13 + $0xe8] sm:$0xf0] }
 0x473   : > { %v958_v3 = vmul.f32 1.442695, %v957_v2  ;;  %1544 = vmatpush.bf16.msrb.mxu3 %v2570_v47  ;;  %v2542_v2 = vor.u32 %v2808_v59, %v2539_v62  ;;  %v2775_v47 = vld [vmem:[#allocation13 + $0x84] sm:$0xf]  ;;  %v2377_v62 = vld [vmem:[#allocation13 + $0x48] sm:$0xf] }
 0x474   : > { %v2406_v52 = vor.u32 %v2775_v47, %v2403_v49  ;;  %v2767_v59 = vld [vmem:[#allocation13 + $0x44] sm:$0xf]  ;;  %v2515_v47 = vld [vmem:[#allocation13 + $0x170] sm:$0xf0]  ;;  %v2806_v49 = vld [vmem:[#allocation13 + $0x174] sm:$0xf0] }
 0x475   : > { %2997 = vpow2.f32 %v958_v3  ;;  %v2799_v3 = vld [vmem:[#allocation13 + $0x144] sm:$0xf] }
 0x477   : > { %1545 = vmatpush.bf16.msrb.mxu3 %v2538_v61  ;;  %v2371_v61 = vld [vmem:[#allocation13 + $0x60] sm:$0xf0] }
 0x47b   : > { %v2998_v4 = vpop.eup %2997 }
 0x47c   : > { %v963_v5 = vpack.c.bf16 %v2998_v4, %v2998_v4  ;;  %v960_v6 = vsel %vm767_vm7, %v2998_v4, 0.0  ;;  %v2499_v4 = vld [vmem:[#allocation13 + $0x160] sm:$0xf0] }
 0x47d   : > { %961 = vadd.xlane.f32.xlu1 %v960_v6  ;;  %v1046_v7 = vpop.xlane.xlu2 %1045  ;;  %v2498_v6 = vor.u32 %v2803_v1, %v2497_v63  ;;  %v2772_v63 = vld [vmem:[#allocation13 + $0x64] sm:$0xf0]  ;;  %v2374_v1 = vor.u32 %v2767_v59, %v2371_v61  ;;  %v2483_v59 = vld [vmem:[#allocation13 + $0x130] sm:$0xf0]  ;;  %v2798_v61 = vld [vmem:[#allocation13 + $0x134] sm:$0xf0] }
 0x47e   : > { %v1047_v8 = vsub.f32 %v1041_v54, %v1046_v7  ;;  %2314 = vmatmul.msk.bf16.vlgmr.msra.gmra.mxu0 %vm767_vm7, %v963_v5  ;;  %v2531_v54 = vld [vmem:[#allocation13 + $0x1a0] sm:$0xf0]  ;;  %v2505_v5 = vld [vmem:[#allocation13 + $0x148] sm:$0xf] }
 0x47f   : > { %v2534_v56 = vor.u32 %v2807_v53, %v2531_v54  ;;  %1557 = vmatpush.bf16.msra.mxu0 %v2574_v51  ;;  %v2804_v7 = vld [vmem:[#allocation13 + $0x164] sm:$0xf0]  ;;  %v2776_v54 = vld [vmem:[#allocation13 + $0x8c] sm:$0xf] }
 0x480   : > { %v1048_v9 = vmul.f32 1.442695, %v1047_v8  ;;  %v864_v10 = vpop.f32.mrf.mxu0  ;;  %v2800_v8 = vld [vmem:[#allocation13 + $0x14c] sm:$0xf]  ;;  %v2780_v51 = vld [vmem:[#allocation13 + $0xa4] sm:$0xf0] }
 0x481   : > { %1532 = vmatpush.bf16.msrb.mxu2 %v2534_v56  ;;  %v2410_v53 = vor.u32 %v2780_v51, %v2409_v50 }
 0x482   : > { %2999 = vpow2.f32 %v1048_v9  ;;  %v2507_v9 = vld [vmem:[#allocation13 + $0x168] sm:$0xf0] }
 0x483   : > { %1558 = vmatpush.bf16.msra.mxu0 %v2542_v2  ;;  %v2378_v2 = vor.u32 %v2772_v63, %v2377_v62 }
 0x485   : > { %v842_v11 = vpop.xlane.xlu2 %841 }
 0x486   : > { %3001 = vrcp.f32 %v842_v11  ;;  %v2506_v11 = vor.u32 %v2804_v7, %v2505_v5  ;;  %v2763_v7 = vld [vmem:[#allocation13 + $0x1c] sm:$0xf0] }
 0x488   : > { %v3000_v12 = vpop.eup %2999  ;;  %v866_v13 = vpop.f32.mrf.mxu0  ;;  %1546 = vmatpush.bf16.msrb.mxu3 %v2506_v11  ;;  %v2345_v11 = vld [vmem:[#allocation13 + $0x8] sm:$0xf] }
 0x489   : > { %v1053_v14 = vpack.c.bf16 %v3000_v12, %v3000_v12  ;;  %v1050_v15 = vsel %vm767_vm7, %v3000_v12, 0.0  ;;  %v2465_v12 = vld [vmem:[#allocation13 + $0x100] sm:$0xf] }
 0x48a   : > { %1051 = vadd.xlane.f32.xlu0 %v1050_v15  ;;  %v2795_v13 = vld [vmem:[#allocation13 + $0x11c] sm:$0xf0]  ;;  %v2510_v15 = vor.u32 %v2800_v8, %v2507_v9  ;;  %v2759_v8 = vld [vmem:[#allocation13 + $0x4] sm:$0xf] }
 0x48b   : > { %2325 = vmatmul.msk.bf16.vlgmr.msra.gmra.mxu3 %vm767_vm7, %v1053_v14  ;;  %v2791_v14 = vld [vmem:[#allocation13 + $0x104] sm:$0xf]  ;;  %v2466_v22 = vor.u32 %v2795_v13, %v2465_v12  ;;  %v2764_v12 = vld [vmem:[#allocation13 + $0x24] sm:$0xf0] }
 0x48c   : > { %v3002_v16 = vpop.eup %3001  ;;  %1559 = vmatpush.bf16.msra.mxu0 %v2510_v15  ;;  %v2760_v15 = vld [vmem:[#allocation13 + $0xc] sm:$0xf] }
 0x48d   : > { %v869_v18 = vmul.f32 %v3002_v16, %v864_v10  ;;  %v2502_v10 = vor.u32 %v2799_v3, %v2499_v4  ;;  %v2467_v16 = vld [vmem:[#allocation13 + $0x120] sm:$0xf0]  ;;  %v2768_v3 = vld [vmem:[#allocation13 + $0x4c] sm:$0xf] }
 0x48e   : > { %v2470_v23 = vor.u32 %v2791_v14, %v2467_v16  ;;  %v2379_v4 = vld [vmem:[#allocation13 + $0x68] sm:$0xf0]  ;;  %v2346_v14 = vor.u32 %v2764_v12, %v2345_v11 }
 0x48f   : > { %v870_v19 = vpack.c.bf16 %v869_v18, %v869_v18  ;;  %v2473_v18 = vld [vmem:[#allocation13 + $0x108] sm:$0xf]  ;;  %1533 = vmatpush.bf16.msrb.mxu2 %v2502_v10  ;;  %v2382_v5 = vor.u32 %v2768_v3, %v2379_v4  ;;  %v2339_v10 = vld [vmem:[#allocation13 + $0x20] sm:$0xf0]  ;;  %v2347_v16 = vld [vmem:[#allocation13 + $0x28] sm:$0xf0] }
 0x490   : > { %v2342_v13 = vor.u32 %v2759_v8, %v2339_v10  ;;  %v2449_v4 = vld [vmem:[#allocation13 + $0xd0] sm:$0xf]  ;;  %v2451_v8 = vld [vmem:[#allocation13 + $0xf0] sm:$0xf0]  ;;  %v2790_v10 = vld [vmem:[#allocation13 + $0xf4] sm:$0xf0] }
 0x491   : > { %2303 = vmatmul.msk.bf16.vlgmr.msrb.gmra.mxu1 %vm747_vm4, %v870_v19  ;;  %v2796_v19 = vld [vmem:[#allocation13 + $0x124] sm:$0xf0] }
 0x492   : > { %1518 = vmatpush.bf16.msrb.mxu1 %v2562_v41  ;;  %v2788_v41 = vld [vmem:[#allocation13 + $0xe4] sm:$0xf0] }
 0x493   : > { %1534 = vmatpush.bf16.msrb.mxu2 %v2470_v23 }
 0x496   : > { %1519 = vmatpush.bf16.msrb.mxu1 %v2530_v55  ;;  %v2411_v55 = vld [vmem:[#allocation13 + $0xa8] sm:$0xf0] }
 0x497   : > { %v2414_v56 = vor.u32 %v2776_v54, %v2411_v55  ;;  %v2481_v55 = vld [vmem:[#allocation13 + $0x110] sm:$0xf] }
 0x49a   : > { %1520 = vmatpush.bf16.msrb.mxu1 %v2498_v6  ;;  %v2337_v6 = vld [vmem:[#allocation13] sm:$0xf] }
 0x49b   : > { %v2338_v9 = vor.u32 %v2763_v7, %v2337_v6  ;;  %v2785_v6 = vld [vmem:[#allocation13 + $0xd4] sm:$0xf] }
 0x49c   : > { %v2454_v11 = vor.u32 %v2785_v6, %v2451_v8  ;;  %v2853_v6 = vld [vmem:[#allocation14 + $0xf0] sm:$0xff]  ;;  %v2846_v8 = vld [vmem:[#allocation14 + $0xb8] sm:$0xff] }
 0x49e   : > { %1521 = vmatpush.bf16.msrb.mxu1 %v2466_v22  ;;  %v2579_v22 = vld [vmem:[#allocation13 + $0x1f0] sm:$0xf0] }
 0x4f0   : > { %v962_v24 = vpop.xlane.xlu1 %961 }
 0x4f1   : > { %3003 = vrcp.f32 %v962_v24  ;;  %v2474_v24 = vor.u32 %v2796_v19, %v2473_v18  ;;  %v2577_v18 = vld [vmem:[#allocation13 + $0x1d0] sm:$0xf]  ;;  %v2350_v19 = vor.u32 %v2760_v15, %v2347_v16 }
 0x4f2   : > { %v2417_v15 = vld [vmem:[#allocation13 + $0x90] sm:$0xf] }
 0x4f3   : > { %1547 = vmatpush.bf16.msrb.mxu3 %v2474_v24 }
 0x4f7   : > { %v3004_v25 = vpop.eup %3003 }
 0x4fb   : > { %v981_v26 = vpop.f32.mrf.mxu0 }
 0x4fc   : > { %v986_v27 = vmul.f32 %v3004_v25, %v981_v26  ;;  %v2478_v26 = vor.u32 %v2792_v20, %v2475_v21  ;;  %v2821_v20 = vld [vmem:[#allocation13 + $0x1ec] sm:$0xf0]  ;;  %v2817_v21 = vld [vmem:[#allocation13 + $0x1d4] sm:$0xf] }
 0x4fd   : > { %v1052_v30 = vpop.xlane.xlu0 %1051  ;;  %v2578_v23 = vor.u32 %v2821_v20, %v2577_v18  ;;  %v2582_v24 = vor.u32 %v2817_v21, %v2579_v22  ;;  %v2781_v18 = vld [vmem:[#allocation13 + $0xac] sm:$0xf0]  ;;  %v2419_v20 = vld [vmem:[#allocation13 + $0xb0] sm:$0xf0]  ;;  %v2425_v22 = vld [vmem:[#allocation13 + $0x98] sm:$0xf] }
 0x4fe   : > { %v987_v28 = vpack.c.bf16 %v986_v27, %v986_v27  ;;  %3005 = vrcp.f32 %v1052_v30  ;;  %1560 = vmatpush.bf16.msra.mxu0 %v2478_v26  ;;  %v2822_v26 = vld [vmem:[#allocation13 + $0x1f4] sm:$0xf0] }
 0x500   : > { %2323 = vmatmul.msk.bf16.vlgmr.msra.gmra.mxu1 %vm747_vm4, %v987_v28 }
 0x503   : > { %v983_v29 = vpop.f32.mrf.mxu0 }
 0x504   : > { %v3006_v31 = vpop.eup %3005 }
 0x50e   : > { %v3638_v32 = vpop.f32.mrf.mxu1  ;;  %v1071_v33 = vpop.f32.mrf.mxu3 }
 0x50f   : > { %v1076_v34 = vmul.f32 %v3006_v31, %v1071_v33  ;;  %v928_v27 = vadd.f32 %v3622_v44, %v3638_v32  ;;  %v2442_v44 = vor.u32 %v2788_v41, %v2441_v40  ;;  %v2784_v32 = vld [vmem:[#allocation13 + $0xcc] sm:$0xf]  ;;  %v2814_v40 = vld [vmem:[#allocation13 + $0x1b4] sm:$0xf0]  ;;  %v2810_v41 = vld [vmem:[#allocation13 + $0x19c] sm:$0xf] }
 0x510   : > { %v2446_v45 = vor.u32 %v2784_v32, %v2443_v43  ;;  %v2513_v43 = vld [vmem:[#allocation13 + $0x150] sm:$0xf] }
 0x511   : > { %v1077_v35 = vpack.c.bf16 %v1076_v34, %v1076_v34  ;;  %1548 = vmatpush.bf16.msrb.mxu3 %v2442_v44 }
 0x512   : > { %1561 = vmatpush.bf16.msra.mxu0 %v2446_v45  ;;  %v2805_v45 = vld [vmem:[#allocation13 + $0x16c] sm:$0xf0] }
 0x513   : > { %2334 = vmatmul.msk.bf16.vlgmr.msrb.gmra.mxu0 %vm747_vm4, %v1077_v35  ;;  %v2433_v35 = vld [vmem:[#allocation13 + $0xc0] sm:$0xf] }
 0x515   : > { %1549 = vmatpush.bf16.msrb.mxu3 %v2410_v53  ;;  %v2523_v53 = vld [vmem:[#allocation13 + $0x178] sm:$0xf0] }
 0x516   : > { %v901_v36 = vpop.f32.mrf.mxu1  ;;  %v1073_v37 = vpop.f32.mrf.mxu3  ;;  %1562 = vmatpush.bf16.msra.mxu0 %v2414_v56  ;;  %v2797_v56 = vld [vmem:[#allocation13 + $0x12c] sm:$0xf0] }
 0x517   : > { %v2787_v36 = vld [vmem:[#allocation13 + $0xdc] sm:$0xf0]  ;;  %v2783_v37 = vld [vmem:[#allocation13 + $0xc4] sm:$0xf] }
 0x518   : > { %v2434_v38 = vor.u32 %v2787_v36, %v2433_v35  ;;  %v2438_v42 = vor.u32 %v2783_v37, %v2435_v39  ;;  %v2809_v36 = vld [vmem:[#allocation13 + $0x194] sm:$0xf] }
 0x519   : > { %1550 = vmatpush.bf16.msrb.mxu3 %v2378_v2  ;;  %v2547_v37 = vld [vmem:[#allocation13 + $0x1b0] sm:$0xf0]  ;;  %v2491_v2 = vld [vmem:[#allocation13 + $0x138] sm:$0xf0] }
 0x51a   : > { %1522 = vmatpush.bf16.msrb.mxu1 %v2434_v38  ;;  %1535 = vmatpush.bf16.msrb.mxu2 %v2438_v42  ;;  %v2553_v38 = vld [vmem:[#allocation13 + $0x198] sm:$0xf]  ;;  %v2550_v39 = vor.u32 %v2809_v36, %v2547_v37  ;;  %v2555_v42 = vld [vmem:[#allocation13 + $0x1b8] sm:$0xf0] }
 0x51b   : > { %1563 = vmatpush.bf16.msra.mxu0 %v2382_v5  ;;  %v2554_v44 = vor.u32 %v2814_v40, %v2553_v38  ;;  %v2558_v32 = vor.u32 %v2810_v41, %v2555_v42  ;;  %v2789_v5 = vld [vmem:[#allocation13 + $0xec] sm:$0xf0]  ;;  %v2393_v38 = vld [vmem:[#allocation13 + $0x58] sm:$0xf]  ;;  %v2770_v40 = vld [vmem:[#allocation13 + $0x5c] sm:$0xf] }
 0x51c   : > { %v2450_v7 = vor.u32 %v2789_v5, %v2449_v4  ;;  %v2395_v41 = vld [vmem:[#allocation13 + $0x78] sm:$0xf0]  ;;  %v2829_v5 = vld [vmem:[#allocation14 + $0x30] sm:$0xff] }
 0x51d   : > { %1551 = vmatpush.bf16.msrb.mxu3 %v2346_v14  ;;  %v2459_v14 = vld [vmem:[#allocation13 + $0xf8] sm:$0xf0] }
 0x51e   : > { %1536 = vmatpush.bf16.msrb.mxu2 %v2406_v52  ;;  %v2802_v52 = vld [vmem:[#allocation13 + $0x15c] sm:$0xf] }
 0x51f   : > { %1564 = vmatpush.bf16.msra.mxu0 %v2350_v19  ;;  %v2526_v54 = vor.u32 %v2802_v52, %v2523_v53  ;;  %v2777_v19 = vld [vmem:[#allocation13 + $0x94] sm:$0xf]  ;;  %v2854_v4 = vld [vmem:[#allocation14 + $0xf8] sm:$0xff] }
 0x522   : > { %1537 = vmatpush.bf16.msrb.mxu2 %v2374_v1  ;;  %v2794_v1 = vld [vmem:[#allocation13 + $0x11c] sm:$0xf] }
 0x523   : > { %v2494_v3 = vor.u32 %v2794_v1, %v2491_v2 }
 0x526   : > { %1538 = vmatpush.bf16.msrb.mxu2 %v2342_v13  ;;  %v2786_v13 = vld [vmem:[#allocation13 + $0xdc] sm:$0xf] }
 0x527   : > { %v2462_v16 = vor.u32 %v2786_v13, %v2459_v14  ;;  %v2827_v13 = vld [vmem:[#allocation14 + $0x20] sm:$0xff] }
 0x528   : > { %v2851_v14 = vld [vmem:[#allocation14 + $0xe0] sm:$0xff] }
 0x52a   : > { %1583 = vmatpush.bf16.msra.mxu2 %v2582_v24  ;;  %v2778_v24 = vld [vmem:[#allocation13 + $0x9c] sm:$0xf] }
 0x52e   : > { %1584 = vmatpush.bf16.msra.mxu2 %v2550_v39  ;;  %v2774_v39 = vld [vmem:[#allocation13 + $0x74] sm:$0xf0] }
 0x57d   : > { %v1016_v60 = vpop.f32.mrf.mxu1 }
 0x57e   : > { %v1020_v28 = vadd.f32 %v1016_v60, %v928_v27  ;;  %v2370_v60 = vor.u32 %v2771_v58, %v2369_v57  ;;  %v2818_v27 = vld [vmem:[#allocation13 + $0x1dc] sm:$0xf]  ;;  %v2793_v57 = vld [vmem:[#allocation13 + $0x114] sm:$0xf]  ;;  %v2482_v58 = vor.u32 %v2797_v56, %v2481_v55 }
 0x57f   : > { %v2486_v62 = vor.u32 %v2793_v57, %v2483_v59 }
 0x585   : > { %v1018_v25 = vpop.f32.mrf.mxu1 }
 0x586   : > { %v2585_v25 = vld [vmem:[#allocation13 + $0x1d8] sm:$0xf] }
 0x590   : > { %v1106_v29 = vpop.f32.mrf.mxu0 }
 0x591   : > { %v1110_v30 = vadd.f32 %v1106_v29, %v1020_v28  ;;  %v2586_v28 = vor.u32 %v2822_v26, %v2585_v25  ;;  %v2587_v29 = vld [vmem:[#allocation13 + $0x1f8] sm:$0xf0]  ;;  %v2418_v26 = vor.u32 %v2781_v18, %v2417_v15  ;;  %v2836_v15 = vld [vmem:[#allocation14 + $0x68] sm:$0xff] }
 0x592   : > { %v2826_v18 = vld [vmem:[#allocation14 + $0x18] sm:$0xff] }
 0x593   : > { %v3644_v31 = vadd.f32 %v1110_v30, %v3583_v0  ;;  %v2401_v0 = vld [vmem:[#allocation13 + $0x80] sm:$0xf]  ;;  %v2545_v30 = vld [vmem:[#allocation13 + $0x190] sm:$0xf]  ;;  %1596 = vmatpush.bf16.msra.mxu3 %v2586_v28  ;;  %v2427_v28 = vld [vmem:[#allocation13 + $0xb8] sm:$0xf0] }
 0x594   : > { %v2402_v48 = vor.u32 %v2779_v46, %v2401_v0  ;;  %v2801_v0 = vld [vmem:[#allocation13 + $0x154] sm:$0xf]  ;;  %v2514_v46 = vor.u32 %v2805_v45, %v2513_v43  ;;  %v2430_v37 = vor.u32 %v2778_v24, %v2427_v28  ;;  %v2765_v43 = vld [vmem:[#allocation13 + $0x2c] sm:$0xf0]  ;;  %v2834_v24 = vld [vmem:[#allocation14 + $0x58] sm:$0xff] }
 0x595   : > { %v1112_v33 = vmul.f32 %v3644_v31, %v3644_v31  ;;  %v2518_v50 = vor.u32 %v2801_v0, %v2515_v47  ;;  %v2761_v45 = vld [vmem:[#allocation13 + $0x14] sm:$0xf]  ;;  %v2361_v47 = vld [vmem:[#allocation13 + $0x18] sm:$0xf] }
 0x596   : > { %1523 = vmatpush.bf16.msrb.mxu1 %v2402_v48  ;;  %v2521_v48 = vld [vmem:[#allocation13 + $0x158] sm:$0xf]  ;;  %v2355_v0 = vld [vmem:[#allocation13 + $0x30] sm:$0xf0] }
 0x597   : > { %1113 = vadd.xlane.f32.xlu2 %v1112_v33  ;;  %v2813_v33 = vld [vmem:[#allocation13 + $0x1ac] sm:$0xf0]  ;;  %1597 = vmatpush.bf16.msra.mxu3 %v2554_v44  ;;  %v2522_v51 = vor.u32 %v2806_v49, %v2521_v48  ;;  %v2766_v48 = vld [vmem:[#allocation13 + $0x34] sm:$0xf0]  ;;  %v2762_v49 = vld [vmem:[#allocation13 + $0x1c] sm:$0xf]  ;;  %v2358_v52 = vor.u32 %v2761_v45, %v2355_v0 }
 0x598   : > { %v1108_v34 = vpop.f32.mrf.mxu0  ;;  %v2546_v35 = vor.u32 %v2813_v33, %v2545_v30  ;;  %1585 = vmatpush.bf16.msra.mxu2 %v2518_v50  ;;  %v2773_v33 = vld [vmem:[#allocation13 + $0x6c] sm:$0xf0]  ;;  %v2363_v50 = vld [vmem:[#allocation13 + $0x38] sm:$0xf0]  ;;  %v2362_v53 = vor.u32 %v2766_v48, %v2361_v47 }
 0x599   : > { %v2590_v34 = vor.u32 %v2818_v27, %v2587_v29  ;;  %v2422_v27 = vor.u32 %v2777_v19, %v2419_v20  ;;  %v2385_v29 = vld [vmem:[#allocation13 + $0x50] sm:$0xf]  ;;  %v2366_v55 = vor.u32 %v2762_v49, %v2363_v50  ;;  %v2850_v19 = vld [vmem:[#allocation14 + $0xd8] sm:$0xff]  ;;  %v2835_v20 = vld [vmem:[#allocation14 + $0x60] sm:$0xff] }
 0x59a   : > { %1524 = vmatpush.bf16.msrb.mxu1 %v2370_v60  ;;  %v2489_v60 = vld [vmem:[#allocation13 + $0x118] sm:$0xf]  ;;  %v2353_v44 = vld [vmem:[#allocation13 + $0x10] sm:$0xf] }
 0x59b   : > { %1609 = vmatpush.bf16.msrb.mxu0 %v2590_v34  ;;  %1598 = vmatpush.bf16.msra.mxu3 %v2522_v51  ;;  %v2490_v63 = vor.u32 %v2798_v61, %v2489_v60  ;;  %v2769_v34 = vld [vmem:[#allocation13 + $0x54] sm:$0xf]  ;;  %v2354_v51 = vor.u32 %v2765_v43, %v2353_v44  ;;  %v2986_v61 = vld [vmem:[%s3725_s5] ss:$0 sm:$0xff]  ;;  %v2839_v44 = vld [vmem:[#allocation14 + $0x80] sm:$0xff] }
 0x59c   : > { %1586 = vmatpush.bf16.msra.mxu2 %v2486_v62  ;;  %v2833_v28 = vld [vmem:[#allocation14 + $0x50] sm:$0xff] }
 0x59e   : > { %1525 = vmatpush.bf16.msrb.mxu1 %v2338_v9  ;;  %v2457_v9 = vld [vmem:[#allocation13 + $0xd8] sm:$0xf] }
 0x59f   : > { %1610 = vmatpush.bf16.msrb.mxu0 %v2558_v32  ;;  %1599 = vmatpush.bf16.msra.mxu3 %v2490_v63  ;;  %v2458_v12 = vor.u32 %v2790_v10, %v2457_v9  ;;  %v2394_v32 = vor.u32 %v2774_v39, %v2393_v38  ;;  %v2828_v9 = vld [vmem:[#allocation14 + $0x28] sm:$0xff] }
 0x5a0   : > { %1587 = vmatpush.bf16.msra.mxu2 %v2454_v11  ;;  %v2852_v10 = vld [vmem:[#allocation14 + $0xe8] sm:$0xff]  ;;  %v2837_v11 = vld [vmem:[#allocation14 + $0x70] sm:$0xff] }
 0x5a1   : > { %v2832_v38 = vld [vmem:[#allocation14 + $0x48] sm:$0xff] }
 0x5a2   : > { %1570 = vmatpush.bf16.msra.mxu1 %v2578_v23  ;;  %v2782_v23 = vld [vmem:[#allocation13 + $0xb4] sm:$0xf0]  ;;  %v2840_v39 = vld [vmem:[#allocation14 + $0x88] sm:$0xff] }
 0x5a3   : > { %1611 = vmatpush.bf16.msrb.mxu0 %v2526_v54  ;;  %1600 = vmatpush.bf16.msra.mxu3 %v2458_v12  ;;  %v2426_v30 = vor.u32 %v2782_v23, %v2425_v22  ;;  %v2845_v12 = vld [vmem:[#allocation14 + $0xb0] sm:$0xff] }
 0x5a4   : > { %1588 = vmatpush.bf16.msra.mxu2 %v2422_v27  ;;  %v2825_v22 = vld [vmem:[#allocation14 + $0x10] sm:$0xff]  ;;  %v2848_v27 = vld [vmem:[#allocation14 + $0xc8] sm:$0xff] }
 0x5a5   : > { %v2849_v23 = vld [vmem:[#allocation14 + $0xd0] sm:$0xff] }
 0x5a6   : > { %1571 = vmatpush.bf16.msra.mxu1 %v2546_v35  ;;  %v2387_v35 = vld [vmem:[#allocation13 + $0x70] sm:$0xf0] }
 0x5a7   : > { %1612 = vmatpush.bf16.msrb.mxu0 %v2494_v3  ;;  %v2390_v42 = vor.u32 %v2769_v34, %v2387_v35  ;;  %1601 = vmatpush.bf16.msra.mxu3 %v2426_v30  ;;  %v2830_v3 = vld [vmem:[#allocation14 + $0x38] sm:$0xff]  ;;  %v2823_v35 = vld [vmem:[#allocation14] sm:$0xff] }
 0x5a9   : > { %1589 = vmatpush.bf16.msra.mxu2 %v2390_v42  ;;  %v2831_v42 = vld [vmem:[#allocation14 + $0x40] sm:$0xff] }
 0x5aa   : > { %1572 = vmatpush.bf16.msra.mxu1 %v2514_v46  ;;  %v2398_v46 = vor.u32 %v2770_v40, %v2395_v41 }
 0x5ab   : > { %1613 = vmatpush.bf16.msrb.mxu0 %v2462_v16  ;;  %1602 = vmatpush.bf16.msra.mxu3 %v2394_v32  ;;  %v2844_v16 = vld [vmem:[#allocation14 + $0xa8] sm:$0xff] }
 0x5ad   : > { %1590 = vmatpush.bf16.msra.mxu2 %v2358_v52 }
 0x5ae   : > { %1573 = vmatpush.bf16.msra.mxu1 %v2482_v58 }
 0x5af   : > { %1614 = vmatpush.bf16.msrb.mxu0 %v2430_v37  ;;  %1603 = vmatpush.bf16.msra.mxu3 %v2362_v53 }
 0x5b2   : > { %1574 = vmatpush.bf16.msra.mxu1 %v2450_v7  ;;  %v2838_v7 = vld [vmem:[#allocation14 + $0x78] sm:$0xff] }
 0x5b3   : > { %1615 = vmatpush.bf16.msrb.mxu0 %v2398_v46 }
 0x5b6   : > { %1575 = vmatpush.bf16.msra.mxu1 %v2418_v26  ;;  %v2824_v26 = vld [vmem:[#allocation14 + $0x8] sm:$0xff] }
 0x5b7   : > { %1616 = vmatpush.bf16.msrb.mxu0 %v2366_v55 }
 0x60a   : > { %v1114_v21 = vpop.xlane.xlu2 %1113 }
 0x60b   : > { %v1115_v25 = vmul.f32 %v1114_v21, %v3587_v17  ;;  %v2386_v17 = vor.u32 %v2773_v33, %v2385_v29  ;;  %v2843_v21 = vld [vmem:[#allocation14 + $0xa0] sm:$0xff]  ;;  %v2841_v29 = vld [vmem:[#allocation14 + $0x90] sm:$0xff] }
 0x60d   : > { %v1116_v36 = vadd.f32 1e-05, %v1115_v25  ;;  %1576 = vmatpush.bf16.msra.mxu1 %v2386_v17  ;;  %v2842_v25 = vld [vmem:[#allocation14 + $0x98] sm:$0xff] }
 0x60f   : > { %3007 = vrsqrt.f32 %v1116_v36  ;;  %vm1123_vm9 = vweird.f32 %v1116_v36 }
 0x611   : > { %1577 = vmatpush.bf16.msra.mxu1 %v2354_v51 }
 0x615   : > { %v3008_v54 = vpop.eup %3007 }
 0x616   : > { %v1118_v56 = vmul.f32 %v3008_v54, %v1116_v36  ;;  %vm1124_vm8 = vweird.f32 %v3008_v54  ;;  %v2847_v36 = vld [vmem:[#allocation14 + $0xc0] sm:$0xff] }
 0x617   : > { %vm1125_vm10 = vmor %vm1123_vm9, %vm1124_vm8 }
 0x618   : > { %v1119_v57 = vmul.f32 %v3008_v54, %v1118_v56 }
 0x61a   : > { %v1120_v58 = vmul.f32 0.5, %v1119_v57 }
 0x61c   : > { %v1121_v59 = vsub.f32 1.5, %v1120_v58 }
 0x61e   : > { %v1122_v60 = vmul.f32 %v3008_v54, %v1121_v59 }
 0x620   : > { %v1126_v62 = vsel %vm1125_vm10, %v3008_v54, %v1122_v60 }
 0x621   : > { %v1127_v63 = vmul.f32 %v1126_v62, %v3644_v31 }
 0x623   : > { %v1132_v1 = vmul.f32 %v2986_v61, %v1127_v63 }
 0x625   : > { %v1133_v2 = vpack.c.bf16 %v1132_v1, %v1132_v1 }
 0x627   : > { %1526 = vmatmul.bf16.vlgmr.msrb.gmra.mxu1 %v1133_v2  ;;  %1539 = vmatmul.bf16.vlgmr.msrb.gmra.mxu2 %v1133_v2 }
 0x628   : > { %1552 = vmatmul.bf16.vlgmr.msrb.gmra.mxu3 %v1133_v2  ;;  %1565 = vmatmul.bf16.vlgmr.msra.gmra.mxu0 %v1133_v2 }
 0x629   : > { %1966 = vmatpush.bf16.msrb.mxu1 %v2830_v3  ;;  %2005 = vmatpush.bf16.msra.mxu0 %v2854_v4 }
 0x62a   : > { %1979 = vmatpush.bf16.msrb.mxu2 %v2838_v7  ;;  %1992 = vmatpush.bf16.msrb.mxu3 %v2846_v8 }
 0x62d   : > { %1967 = vmatpush.bf16.msrb.mxu1 %v2829_v5  ;;  %2006 = vmatpush.bf16.msra.mxu0 %v2853_v6 }
 0x62e   : > { %1980 = vmatpush.bf16.msrb.mxu2 %v2837_v11  ;;  %1993 = vmatpush.bf16.msrb.mxu3 %v2845_v12 }
 0x631   : > { %1968 = vmatpush.bf16.msrb.mxu1 %v2828_v9  ;;  %2007 = vmatpush.bf16.msra.mxu0 %v2852_v10 }
 0x632   : > { %1981 = vmatpush.bf16.msrb.mxu2 %v2836_v15  ;;  %1994 = vmatpush.bf16.msrb.mxu3 %v2844_v16 }
 0x635   : > { %1969 = vmatpush.bf16.msrb.mxu1 %v2827_v13  ;;  %2008 = vmatpush.bf16.msra.mxu0 %v2851_v14 }
 0x636   : > { %1982 = vmatpush.bf16.msrb.mxu2 %v2835_v20  ;;  %1995 = vmatpush.bf16.msrb.mxu3 %v2843_v21 }
 0x637   : > { %1578 = vmatmul.bf16.vlgmr.msra.gmra.mxu1 %v1133_v2  ;;  %1591 = vmatmul.bf16.vlgmr.msra.gmra.mxu2 %v1133_v2 }
 0x638   : > { %1604 = vmatmul.bf16.vlgmr.msra.gmra.mxu3 %v1133_v2  ;;  %1617 = vmatmul.bf16.vlgmr.msrb.gmra.mxu0 %v1133_v2 }
 0x639   : > { %1970 = vmatpush.bf16.msrb.mxu1 %v2826_v18  ;;  %2009 = vmatpush.bf16.msra.mxu0 %v2850_v19 }
 0x63a   : > { %1983 = vmatpush.bf16.msrb.mxu2 %v2834_v24  ;;  %1996 = vmatpush.bf16.msrb.mxu3 %v2842_v25 }
 0x63d   : > { %1971 = vmatpush.bf16.msrb.mxu1 %v2825_v22  ;;  %2010 = vmatpush.bf16.msra.mxu0 %v2849_v23 }
 0x63e   : > { %1984 = vmatpush.bf16.msrb.mxu2 %v2833_v28  ;;  %1997 = vmatpush.bf16.msrb.mxu3 %v2841_v29 }
 0x641   : > { %1972 = vmatpush.bf16.msrb.mxu1 %v2824_v26  ;;  %2011 = vmatpush.bf16.msra.mxu0 %v2848_v27 }
 0x642   : > { %1985 = vmatpush.bf16.msrb.mxu2 %v2832_v38  ;;  %1998 = vmatpush.bf16.msrb.mxu3 %v2840_v39 }
 0x645   : > { %1973 = vmatpush.bf16.msrb.mxu1 %v2823_v35  ;;  %2012 = vmatpush.bf16.msra.mxu0 %v2847_v36 }
 0x646   : > { %1986 = vmatpush.bf16.msrb.mxu2 %v2831_v42  ;;  %1999 = vmatpush.bf16.msrb.mxu3 %v2839_v44 }
 0x6a4   : > { %v3653_v30 = vpop.f32.mrf.mxu1 }
 0x6a5   : > { %v2591_v33 = vmul.f32 -1.442695, %v3653_v30  ;;  %v3656_v34 = vpop.f32.mrf.mxu0 }
 0x6a6   : > { %v2594_v37 = vmul.f32 -1.442695, %v3656_v34 }
 0x6a7   : > { %3009 = vpow2.f32 %v2591_v33 }
 0x6a8   : > { %3011 = vpow2.f32 %v2594_v37 }
 0x6aa   : > { %v3659_v40 = vpop.f32.mrf.mxu2 }
 0x6ab   : > { %v2592_v41 = vmul.f32 -1.442695, %v3659_v40  ;;  %v3662_v17 = vpop.f32.mrf.mxu3 }
 0x6ac   : > { %v2593_v32 = vmul.f32 -1.442695, %v3662_v17  ;;  %v1529_v43 = vpop.f32.mrf.mxu1 }
 0x6ad   : > { %v3010_v45 = vpop.eup %3009  ;;  %3013 = vpow2.f32 %v2592_v41  ;;  %v1568_v0 = vpop.f32.mrf.mxu0 }
 0x6ae   : > { %v3012_v46 = vpop.eup %3011  ;;  %v1634_v47 = vadd.f32 1.0, %v3010_v45  ;;  %3015 = vpow2.f32 %v2593_v32 }
 0x6af   : > { %v1637_v48 = vadd.f32 1.0, %v3012_v46 }
 0x6b0   : > { %3017 = vrcp.f32 %v1634_v47  ;;  %v1647_v62 = vand.u32 2147483647, %v1634_v47  ;;  %v1649_v63 = vand.u32 2147483648, %v1634_v47  ;;  %vm1643_vm12 = vweird.f32 %v1634_v47 }
 0x6b1   : > { %3019 = vrcp.f32 %v1637_v48  ;;  %v1692_v2 = vand.u32 2147483647, %v1637_v48  ;;  %v1694_v3 = vand.u32 2147483648, %v1637_v48  ;;  %vm1688_vm13 = vweird.f32 %v1637_v48 }
 0x6b2   : > { %v1542_v49 = vpop.f32.mrf.mxu2  ;;  %vm1648_vm15 = vcmp.eq.f32.partialorder %v1647_v62, 8.507059e+37  ;;  %v1650_v12 = vor.u32 1.1754944e-38, %v1649_v63 }
 0x6b3   : > { %v3014_v50 = vpop.eup %3013  ;;  %v1555_v51 = vpop.f32.mrf.mxu3  ;;  %vm1693_vm1 = vcmp.eq.f32.partialorder %v1692_v2, 8.507059e+37  ;;  %v1695_v16 = vor.u32 1.1754944e-38, %v1694_v3 }
 0x6b4   : > { %v3016_v52 = vpop.eup %3015  ;;  %v3665_v53 = vadd.f32 1.0, %v3014_v50  ;;  %v1579_v54 = vpop.f32.mrf.mxu1 }
 0x6b5   : > { %v3667_v55 = vadd.f32 1.0, %v3016_v52  ;;  %v1618_v56 = vpop.f32.mrf.mxu0 }
 0x6b6   : > { %v3018_v57 = vpop.eup %3017  ;;  %3021 = vrcp.f32 %v3665_v53  ;;  %v1662_v21 = vand.u32 2147483647, %v3665_v53  ;;  %v1664_v22 = vand.u32 2147483648, %v3665_v53  ;;  %vm1658_vm5 = vweird.f32 %v3665_v53 }
 0x6b7   : > { %v3020_v58 = vpop.eup %3019  ;;  %v1639_v59 = vmul.f32 %v3018_v57, %v1634_v47  ;;  %3023 = vrcp.f32 %v3667_v55  ;;  %vm1644_vm11 = vweird.f32 %v3018_v57  ;;  %v1679_v26 = vand.u32 2147483648, %v3667_v55 }
 0x6b8   : > { %v1684_v60 = vmul.f32 %v3020_v58, %v1637_v48  ;;  %vm1689_vm14 = vweird.f32 %v3020_v58  ;;  %vm1645_vm0 = vmor %vm1643_vm12, %vm1644_vm11  ;;  %v1677_v36 = vand.u32 2147483647, %v3667_v55  ;;  %v1665_v42 = vor.u32 1.1754944e-38, %v1664_v22 }
 0x6b9   : > { %v1640_v61 = vsub.f32 1.0, %v1639_v59  ;;  %vm1690_vm2 = vmor %vm1688_vm13, %vm1689_vm14  ;;  %vm1673_vm7 = vweird.f32 %v3667_v55  ;;  %vm1663_vm8 = vcmp.eq.f32.partialorder %v1662_v21, 8.507059e+37 }
 0x6ba   : > { %v1685_v1 = vsub.f32 1.0, %v1684_v60  ;;  %v1592_v4 = vpop.f32.mrf.mxu2  ;;  %vm1678_vm10 = vcmp.eq.f32.partialorder %v1677_v36, 8.507059e+37 }
 0x6bb   : > { %v1641_v5 = vmul.f32 %v3018_v57, %v1640_v61  ;;  %v1605_v6 = vpop.f32.mrf.mxu3 }
 0x6bc   : > { %v3022_v7 = vpop.eup %3021  ;;  %v1686_v8 = vmul.f32 %v3020_v58, %v1685_v1  ;;  %v1581_v9 = vpop.f32.mrf.mxu1 }
 0x6bd   : > { %v3024_v10 = vpop.eup %3023  ;;  %v1642_v11 = vadd.f32 %v3018_v57, %v1641_v5  ;;  %v1654_v13 = vmul.f32 %v3022_v7, %v3665_v53  ;;  %v1620_v14 = vpop.f32.mrf.mxu0  ;;  %vm1659_vm3 = vweird.f32 %v3022_v7 }
 0x6be   : > { %v1687_v15 = vadd.f32 %v3020_v58, %v1686_v8  ;;  %v1669_v18 = vmul.f32 %v3024_v10, %v3667_v55  ;;  %vm1674_vm4 = vweird.f32 %v3024_v10  ;;  %vm1660_vm6 = vmor %vm1658_vm5, %vm1659_vm3 }
 0x6bf   : > { %v1646_v19 = vsel %vm1645_vm0, %v3018_v57, %v1642_v11  ;;  %v1655_v20 = vsub.f32 1.0, %v1654_v13  ;;  %vm1675_vm9 = vmor %vm1673_vm7, %vm1674_vm4 }
 0x6c0   : > { %v1651_v23 = vsel %vm1648_vm15, %v1650_v12, %v1646_v19  ;;  %v1691_v24 = vsel %vm1690_vm2, %v3020_v58, %v1687_v15  ;;  %v1670_v25 = vsub.f32 1.0, %v1669_v18 }
 0x6c1   : > { %v1698_v27 = vmul.f32 %v1651_v23, %v3653_v30  ;;  %v1696_v28 = vsel %vm1693_vm1, %v1695_v16, %v1691_v24  ;;  %v1656_v29 = vmul.f32 %v3022_v7, %v1655_v20 }
 0x6c2   : > { %v1701_v33 = vmul.f32 %v1696_v28, %v3656_v34  ;;  %v1671_v35 = vmul.f32 %v3024_v10, %v1670_v25  ;;  %v1594_v37 = vpop.f32.mrf.mxu2  ;;  %v1680_v34 = vor.u32 1.1754944e-38, %v1679_v26 }
 0x6c3   : > { %v1657_v38 = vadd.f32 %v3022_v7, %v1656_v29  ;;  %v1702_v39 = vmul.f32 %v1698_v27, %v1579_v54  ;;  %v1607_v41 = vpop.f32.mrf.mxu3 }
 0x6c4   : > { %v1672_v44 = vadd.f32 %v3024_v10, %v1671_v35  ;;  %v1705_v30 = vmul.f32 %v1701_v33, %v1618_v56 }
 0x6c5   : > { %v1661_v32 = vsel %vm1660_vm6, %v3022_v7, %v1657_v38  ;;  %v1706_v43 = vpack.c.bf16 %v1702_v39, %v1702_v39 }
 0x6c6   : > { %v1666_v45 = vsel %vm1663_vm8, %v1665_v42, %v1661_v32  ;;  %v1676_v0 = vsel %vm1675_vm9, %v3024_v10, %v1672_v44  ;;  %v1709_v46 = vpack.c.bf16 %v1705_v30, %v1705_v30 }
 0x6c7   : > { %v1699_v47 = vmul.f32 %v1666_v45, %v3659_v40  ;;  %v1681_v48 = vsel %vm1678_vm10, %v1680_v34, %v1676_v0  ;;  %1974 = vmatmul.bf16.vlgmr.msrb.gmra.mxu1 %v1706_v43 }
 0x6c8   : > { %v1700_v49 = vmul.f32 %v1681_v48, %v3662_v17  ;;  %2013 = vmatmul.bf16.vlgmr.msra.gmra.mxu0 %v1709_v46 }
 0x6c9   : > { %v1703_v50 = vmul.f32 %v1699_v47, %v1592_v4 }
 0x6ca   : > { %v1704_v51 = vmul.f32 %v1700_v49, %v1605_v6 }
 0x6cb   : > { %v1707_v52 = vpack.c.bf16 %v1703_v50, %v1703_v50 }
 0x6cc   : > { %v1708_v53 = vpack.c.bf16 %v1704_v51, %v1704_v51 }
 0x6cd   : > { %1987 = vmatmul.bf16.vlgmr.msrb.gmra.mxu2 %v1707_v52 }
 0x6ce   : > { %2000 = vmatmul.bf16.vlgmr.msrb.gmra.mxu3 %v1708_v53 }
 0x744   : > { %v1975_v54 = vpop.f32.mrf.mxu1 }
 0x745   : > { %v2014_v55 = vpop.f32.mrf.mxu0 }
 0x74c   : > { %v1977_v56 = vpop.f32.mrf.mxu1 }
 0x74d   : > { %v2016_v57 = vpop.f32.mrf.mxu0 }
 0x750   : > { %v1988_v58 = vpop.f32.mrf.mxu2 }
 0x751   : > { %v1989_v40 = vadd.f32 %v1988_v58, %v1975_v54  ;;  %v2001_v59 = vpop.f32.mrf.mxu3 }
 0x753   : > { %v2002_v17 = vadd.f32 %v2001_v59, %v1989_v40 }
 0x755   : > { %v2015_v60 = vadd.f32 %v2014_v55, %v2002_v17 }
 0x757   : > { %v2018_v61 = vadd.f32 %v2015_v60, %v3644_v31 }
 0x758   : > { %v1990_v62 = vpop.f32.mrf.mxu2 }
 0x759   : > { %v2003_v63 = vpop.f32.mrf.mxu3  ;;  %2019 = vst [vmem:[%s486_s6] sm:$0xff] %v2018_v61 }
 0x75a   : > { %3292 = shalt.err (!%p3289_p9)
}
 0x75b   : > { %2885 = dma.vmem_to_hbm [thread:$0]  (%p3526_p13), %s2034_s21, 128, %s2036_s27, %s2021_s20  }
 0x75c PF: > { %s2047_s28 = sand.u32 1, %s3335_s13   ;;  %p3745_p10 = scmp.ge.s32.totalorder %s3347_s16, 2 }
 0x75d   : > { %s2048_s11 = scalar_lea.sflag [#allocation4], %s2047_s28 }
 0x75e   : > { %p2914_p11 = pnand %p3745_p10, %p3531_p5 }
 0x760   : > { %p2915_p0 = pneg %p2914_p11 }
 0x762   : > { %3330 = dma.done.wait (%p2915_p0), %s2048_s11, 128  }
 0x763   : > { %3332 = vsyncadd (%p2915_p0), %s2048_s11, 4294967168  ;;  %p27_p2 = scmp.ge.s32.totalorder %s3506_s12, 4   ;;  %s3746_s13 = smov %s3339_s14 }
 0x764   : > { %s3747_s14 = smov %s3343_s15  ;;  %s3748_s15 = smov %s3518_s30 }
 0x765   : > { %s3749_s16 = smov %s3506_s12  ;;  %29 = sbr.rel (!%p27_p2) target bundleno = 14 (0xe), region = 133 }
 0x76a   :  { %2054 = vsyncpa [#allocation3], 1 }
 0x76b   :  { %2056 = vsyncpa [#allocation3 + $0x1], 1 }
 0x76c   :  { %2057 = vsyncpa [#allocation6], 1 }
 0x76d   :  { %2058 = vsyncpa [#allocation9], 1 }
 0x76e   :  { %2059 = vsyncpa [#allocation12], 1 }
 0x76f   :  { %2060 = vsyncpa [#allocation15], 1 }
 0x770   :  { %2061 = vsyncpa [#allocation4], 1 }
 0x771   :  { %2063 = vsyncpa [#allocation4 + $0x1], 1 }

</bundles_post_ra>
